<compile_context>
chip_gen: v5e
topology: v5e:2x2
jax: 0.10.0
libtpu: 0.0.40
codegen_flags: <defaults>
</compile_context>

<pallas_src>
import math
import functools

import jax
import jax.numpy as jnp
import numpy as np
from jax.experimental import pallas as pl
from jax.experimental.pallas import tpu as pltpu

BN_EPS = 1e-5
SQRT_HALF = math.sqrt(0.5)


# ----------------------------------------------------------------------------
# Fused GLU_Block kernel
# ----------------------------------------------------------------------------
def _glu_block_kernel(*refs, n_glu, output_dim, vbs, chunks, first):
    """Fused GLU block for one (chunks * vbs)-row slab of the batch.

    refs = (x_ref, w_0, gamma_0, beta_0, ..., w_{n-1}, gamma_{n-1}, beta_{n-1},
            out_ref)
    """
    x_ref = refs[0]
    out_ref = refs[-1]
    param_refs = refs[1:-1]

    # Running activation; kept entirely on-chip for the whole block.
    act = x_ref[...]                                     # (chunks*vbs, din)

    for layer in range(n_glu):
        w_ref = param_refs[3 * layer + 0]
        g_ref = param_refs[3 * layer + 1]
        b_ref = param_refs[3 * layer + 2]

        # fc (no bias).  Operands stay in their native dtype; accumulate f32.
        h = jnp.dot(act, w_ref[...],
                    preferred_element_type=jnp.float32)  # (chunks*vbs, 2*dout)

        # Ghost BatchNorm: stats per 128-row virtual batch (biased variance).
        h3 = h.reshape(chunks, vbs, 2 * output_dim)
        mean = jnp.mean(h3, axis=1, keepdims=True)                 # (chunks,1,2d)
        var = jnp.mean((h3 - mean) * (h3 - mean), axis=1, keepdims=True)
        # Fold gamma into the normalization scale (saves one full-tile mul).
        scale = g_ref[...].astype(jnp.float32) * jax.lax.rsqrt(var + BN_EPS)
        hn = (h3 - mean) * scale + b_ref[...].astype(jnp.float32)
        hn = hn.reshape(chunks * vbs, 2 * output_dim)

        # GLU gate (f32 elementwise; EUP handles the sigmoid exp).
        glu = hn[:, :output_dim] * jax.nn.sigmoid(hn[:, output_dim:])

        if layer == 0 and first:
            act = glu                                    # first layer: no residual
        else:
            act = (act.astype(jnp.float32) + glu) * jnp.float32(SQRT_HALF)

    out_ref[...] = act.astype(out_ref.dtype)


# ----------------------------------------------------------------------------
# pallas_call wrapper
# ----------------------------------------------------------------------------
def _pick_chunks_per_step(n_vb, k_max=8):
    """Largest divisor of n_vb that is <= k_max, preferring a grid of >= 2
    steps (so both TensorCores get work on multi-core chips)."""
    candidates = [d for d in range(1, min(k_max, n_vb) + 1) if n_vb % d == 0]
    if n_vb >= 2:
        two_step = [d for d in candidates if n_vb // d >= 2]
        if two_step:
            return max(two_step)
    return max(candidates)


def glu_block_forward(x, params, output_dim, first=False,
                      virtual_batch_size=128, max_chunks_per_step=8):
    """Fused GLU_Block forward.

    x:      (B, input_dim)
    params: list of (w, gamma, beta) per layer; w stored as (d_in, 2*output_dim)
            (i.e. torch Linear weight transposed), gamma/beta as (1, 2*output_dim).
    """
    B, input_dim = x.shape
    n_glu = len(params)
    vbs = min(virtual_batch_size, B)
    # TODO(synk): PyTorch GBN allows a ragged last virtual batch via chunk();
    # this kernel requires B to be a multiple of the virtual batch size.
    assert B % vbs == 0, "B must be a multiple of the virtual batch size"
    n_vb = B // vbs
    chunks = _pick_chunks_per_step(n_vb, max_chunks_per_step)
    rows = chunks * vbs
    grid = (n_vb // chunks,)

    kernel = functools.partial(
        _glu_block_kernel, n_glu=n_glu, output_dim=output_dim,
        vbs=vbs, chunks=chunks, first=first)

    flat_params = []
    in_specs = [pl.BlockSpec((rows, input_dim), lambda i: (i, 0))]
    for (w, g, b) in params:
        flat_params += [w, g, b]
        # Constant (0,0) index maps -> weights stay resident in VMEM.
        in_specs += [
            pl.BlockSpec(w.shape, lambda i: (0, 0)),
            pl.BlockSpec(g.shape, lambda i: (0, 0)),
            pl.BlockSpec(b.shape, lambda i: (0, 0)),
        ]

    return pl.pallas_call(
        kernel,
        out_shape=jax.ShapeDtypeStruct((B, output_dim), x.dtype),
        grid_spec=pltpu.PrefetchScalarGridSpec(
            num_scalar_prefetch=0,
            grid=grid,
            in_specs=in_specs,
            out_specs=pl.BlockSpec((rows, output_dim), lambda i: (i, 0)),
        ),
        compiler_params=pltpu.CompilerParams(
            dimension_semantics=("parallel",)),
    )(x, *flat_params)


# ----------------------------------------------------------------------------
# Parameter init (mirrors torch initialize_glu; gamma=1, beta=0)
# ----------------------------------------------------------------------------
def init_glu_block_params(key, input_dim, output_dim, n_glu=2):
    params = []
    din = input_dim
    for _ in range(n_glu):
        key, sub = jax.random.split(key)
        fan_in, fan_out = din, 2 * output_dim
        gain = math.sqrt((din + 2 * output_dim) / math.sqrt(din))
        std = gain * math.sqrt(2.0 / (fan_in + fan_out))
        # torch Linear weight is (2*out, in); store transposed (in, 2*out).
        w = std * jax.random.normal(sub, (din, 2 * output_dim), dtype=jnp.float32)
        gamma = jnp.ones((1, 2 * output_dim), dtype=jnp.float32)
        beta = jnp.zeros((1, 2 * output_dim), dtype=jnp.float32)
        params.append((w, gamma, beta))
        din = output_dim
    return params


# ----------------------------------------------------------------------------
# Pure-JAX reference (self-check)
# ----------------------------------------------------------------------------
def _ref_glu_layer(x, w, gamma, beta, output_dim, vbs):
    h = x @ w
    B = h.shape[0]
    n_chunks = B // min(vbs, B)
    outs = []
    for c in jnp.split(h, n_chunks, axis=0):
        mean = jnp.mean(c, axis=0, keepdims=True)
        var = jnp.mean((c - mean) ** 2, axis=0, keepdims=True)
        outs.append((c - mean) / jnp.sqrt(var + BN_EPS) * gamma + beta)
    hn = jnp.concatenate(outs, axis=0)
    return hn[:, :output_dim] * jax.nn.sigmoid(hn[:, output_dim:])


def _ref_glu_block(x, params, output_dim, first, vbs):
    n_glu = len(params)
    if first:
        w, g, b = params[0]
        x = _ref_glu_layer(x, w, g, b, output_dim, vbs)
        layers_left = range(1, n_glu)
    else:
        layers_left = range(n_glu)
    for glu_id in layers_left:
        w, g, b = params[glu_id]
        x = (x + _ref_glu_layer(x, w, g, b, output_dim, vbs)) * SQRT_HALF
    return x


# ----------------------------------------------------------------------------
if __name__ == "__main__":
    key = jax.random.PRNGKey(0)

    B = 256                 # two virtual batches of 128
    input_dim = 32
    output_dim = 16
    n_glu = 2
    vbs = 128

    # --- Case 1: first=True (input_dim != output_dim, no residual on layer 0)
    key, kx, kp = jax.random.split(key, 3)
    x = jax.random.normal(kx, (B, input_dim), dtype=jnp.float32)
    params = init_glu_block_params(kp, input_dim, output_dim, n_glu=n_glu)

    out = glu_block_forward(x, params, output_dim, first=True,
                            virtual_batch_size=vbs)
    out = jax.block_until_ready(out)
    ref = _ref_glu_block(x, params, output_dim, True, vbs)
    np.testing.assert_allclose(np.asarray(out), np.asarray(ref),
                               rtol=1e-3, atol=1e-3)

    # --- Case 2: first=False (residual on every layer; requires din == dout)
    key, kx2, kp2 = jax.random.split(key, 3)
    x2 = jax.random.normal(kx2, (B, output_dim), dtype=jnp.float32)
    params2 = init_glu_block_params(kp2, output_dim, output_dim, n_glu=n_glu)

    out2 = glu_block_forward(x2, params2, output_dim, first=False,
                             virtual_batch_size=vbs)
    out2 = jax.block_until_ready(out2)
    ref2 = _ref_glu_block(x2, params2, output_dim, False, vbs)
    np.testing.assert_allclose(np.asarray(out2), np.asarray(ref2),
                               rtol=1e-3, atol=1e-3)

    print("KERNEL_OK")
</pallas_src>

<mosaic_0001>
module attributes {stable_mosaic.version = 11 : i64} {
  func.func @_glu_block_kernel(%arg0: i32, %arg1: memref<128x32xf32, #tpu.memory_space<vmem>>, %arg2: memref<32x32xf32, #tpu.memory_space<vmem>>, %arg3: memref<1x32xf32, #tpu.memory_space<vmem>>, %arg4: memref<1x32xf32, #tpu.memory_space<vmem>>, %arg5: memref<16x32xf32, #tpu.memory_space<vmem>>, %arg6: memref<1x32xf32, #tpu.memory_space<vmem>>, %arg7: memref<1x32xf32, #tpu.memory_space<vmem>>, %arg8: memref<128x16xf32, #tpu.memory_space<vmem>>) attributes {dimension_semantics = [#tpu.dimension_semantics<parallel>], iteration_bounds = array<i64: 2>, scalar_prefetch = 0 : i64, scratch_operands = 0 : i64, tpu.core_type = #tpu.core_type<tc>, window_params = [{transform_indices = @transform_0, window_bounds = array<i64: 128, 32>}, {pipeline_mode = #tpu.pipeline_mode<synchronous>, transform_indices = @transform_1, window_bounds = array<i64: 32, 32>}, {pipeline_mode = #tpu.pipeline_mode<synchronous>, transform_indices = @transform_2, window_bounds = array<i64: 1, 32>}, {pipeline_mode = #tpu.pipeline_mode<synchronous>, transform_indices = @transform_3, window_bounds = array<i64: 1, 32>}, {pipeline_mode = #tpu.pipeline_mode<synchronous>, transform_indices = @transform_4, window_bounds = array<i64: 16, 32>}, {pipeline_mode = #tpu.pipeline_mode<synchronous>, transform_indices = @transform_5, window_bounds = array<i64: 1, 32>}, {pipeline_mode = #tpu.pipeline_mode<synchronous>, transform_indices = @transform_6, window_bounds = array<i64: 1, 32>}, {transform_indices = @transform_7, window_bounds = array<i64: 128, 16>}]} {
    %c0 = arith.constant 0 : index
    %c0_0 = arith.constant 0 : index
    %0 = vector.load %arg1[%c0, %c0_0] : memref<128x32xf32, #tpu.memory_space<vmem>>, vector<128x32xf32>
    %c0_1 = arith.constant 0 : index
    %c0_2 = arith.constant 0 : index
    %1 = vector.load %arg2[%c0_1, %c0_2] : memref<32x32xf32, #tpu.memory_space<vmem>>, vector<32x32xf32>
    %cst = arith.constant dense<0.000000e+00> : vector<128x32xf32>
    %2 = tpu.matmul %0, %1, %cst {dimension_numbers = #tpu.dot_dimension_numbers<[1], [0], [0], [1], [0, 0, 1, 1], [], []>} : vector<128x32xf32>, vector<32x32xf32>, vector<128x32xf32> -> vector<128x32xf32>
    %3 = vector.shape_cast %2 : vector<128x32xf32> to vector<1x128x32xf32>
    %cst_3 = arith.constant dense<0.000000e+00> : vector<1x32xf32>
    %4 = vector.multi_reduction <add>, %3, %cst_3 [1] : vector<1x128x32xf32> to vector<1x32xf32>
    %5 = vector.shape_cast %4 : vector<1x32xf32> to vector<1x1x32xf32>
    %cst_4 = arith.constant 1.280000e+02 : f32
    %6 = vector.broadcast %cst_4 : f32 to vector<1x1x32xf32>
    %7 = arith.divf %5, %6 : vector<1x1x32xf32>
    %8 = vector.broadcast %7 : vector<1x1x32xf32> to vector<1x128x32xf32>
    %9 = arith.subf %3, %8 : vector<1x128x32xf32>
    %10 = vector.broadcast %7 : vector<1x1x32xf32> to vector<1x128x32xf32>
    %11 = arith.subf %3, %10 : vector<1x128x32xf32>
    %12 = arith.mulf %9, %11 : vector<1x128x32xf32>
    %cst_5 = arith.constant dense<0.000000e+00> : vector<1x32xf32>
    %13 = vector.multi_reduction <add>, %12, %cst_5 [1] : vector<1x128x32xf32> to vector<1x32xf32>
    %14 = vector.shape_cast %13 : vector<1x32xf32> to vector<1x1x32xf32>
    %cst_6 = arith.constant 1.280000e+02 : f32
    %15 = vector.broadcast %cst_6 : f32 to vector<1x1x32xf32>
    %16 = arith.divf %14, %15 : vector<1x1x32xf32>
    %c0_7 = arith.constant 0 : index
    %c0_8 = arith.constant 0 : index
    %17 = vector.load %arg3[%c0_7, %c0_8] : memref<1x32xf32, #tpu.memory_space<vmem>>, vector<1x32xf32>
    %cst_9 = arith.constant 9.99999974E-6 : f32
    %18 = vector.broadcast %cst_9 : f32 to vector<1x1x32xf32>
    %19 = arith.addf %16, %18 : vector<1x1x32xf32>
    %20 = math.rsqrt %19 : vector<1x1x32xf32>
    %21 = vector.shape_cast %17 : vector<1x32xf32> to vector<1x1x32xf32>
    %22 = arith.mulf %21, %20 : vector<1x1x32xf32>
    %23 = vector.broadcast %7 : vector<1x1x32xf32> to vector<1x128x32xf32>
    %24 = arith.subf %3, %23 : vector<1x128x32xf32>
    %25 = vector.broadcast %22 : vector<1x1x32xf32> to vector<1x128x32xf32>
    %26 = arith.mulf %24, %25 : vector<1x128x32xf32>
    %c0_10 = arith.constant 0 : index
    %c0_11 = arith.constant 0 : index
    %27 = vector.load %arg4[%c0_10, %c0_11] : memref<1x32xf32, #tpu.memory_space<vmem>>, vector<1x32xf32>
    %28 = vector.shape_cast %27 : vector<1x32xf32> to vector<1x1x32xf32>
    %29 = vector.broadcast %28 : vector<1x1x32xf32> to vector<1x128x32xf32>
    %30 = arith.addf %26, %29 : vector<1x128x32xf32>
    %31 = vector.shape_cast %30 : vector<1x128x32xf32> to vector<128x32xf32>
    %32 = vector.extract_strided_slice %31 {offsets = [0, 0], sizes = [128, 16], strides = [1, 1]} : vector<128x32xf32> to vector<128x16xf32>
    %33 = vector.extract_strided_slice %31 {offsets = [0, 16], sizes = [128, 16], strides = [1, 1]} : vector<128x32xf32> to vector<128x16xf32>
    %34 = arith.negf %33 : vector<128x16xf32>
    %35 = math.exp %34 : vector<128x16xf32>
    %cst_12 = arith.constant 1.000000e+00 : f32
    %36 = vector.broadcast %cst_12 : f32 to vector<128x16xf32>
    %37 = arith.addf %36, %35 : vector<128x16xf32>
    %38 = arith.divf %36, %37 : vector<128x16xf32>
    %39 = arith.mulf %32, %38 : vector<128x16xf32>
    %c0_13 = arith.constant 0 : index
    %c0_14 = arith.constant 0 : index
    %40 = vector.load %arg5[%c0_13, %c0_14] : memref<16x32xf32, #tpu.memory_space<vmem>>, vector<16x32xf32>
    %cst_15 = arith.constant dense<0.000000e+00> : vector<128x32xf32>
    %41 = tpu.matmul %39, %40, %cst_15 {dimension_numbers = #tpu.dot_dimension_numbers<[1], [0], [0], [1], [0, 0, 1, 1], [], []>} : vector<128x16xf32>, vector<16x32xf32>, vector<128x32xf32> -> vector<128x32xf32>
    %42 = vector.shape_cast %41 : vector<128x32xf32> to vector<1x128x32xf32>
    %cst_16 = arith.constant dense<0.000000e+00> : vector<1x32xf32>
    %43 = vector.multi_reduction <add>, %42, %cst_16 [1] : vector<1x128x32xf32> to vector<1x32xf32>
    %44 = vector.shape_cast %43 : vector<1x32xf32> to vector<1x1x32xf32>
    %cst_17 = arith.constant 1.280000e+02 : f32
    %45 = vector.broadcast %cst_17 : f32 to vector<1x1x32xf32>
    %46 = arith.divf %44, %45 : vector<1x1x32xf32>
    %47 = vector.broadcast %46 : vector<1x1x32xf32> to vector<1x128x32xf32>
    %48 = arith.subf %42, %47 : vector<1x128x32xf32>
    %49 = vector.broadcast %46 : vector<1x1x32xf32> to vector<1x128x32xf32>
    %50 = arith.subf %42, %49 : vector<1x128x32xf32>
    %51 = arith.mulf %48, %50 : vector<1x128x32xf32>
    %cst_18 = arith.constant dense<0.000000e+00> : vector<1x32xf32>
    %52 = vector.multi_reduction <add>, %51, %cst_18 [1] : vector<1x128x32xf32> to vector<1x32xf32>
    %53 = vector.shape_cast %52 : vector<1x32xf32> to vector<1x1x32xf32>
    %cst_19 = arith.constant 1.280000e+02 : f32
    %54 = vector.broadcast %cst_19 : f32 to vector<1x1x32xf32>
    %55 = arith.divf %53, %54 : vector<1x1x32xf32>
    %c0_20 = arith.constant 0 : index
    %c0_21 = arith.constant 0 : index
    %56 = vector.load %arg6[%c0_20, %c0_21] : memref<1x32xf32, #tpu.memory_space<vmem>>, vector<1x32xf32>
    %cst_22 = arith.constant 9.99999974E-6 : f32
    %57 = vector.broadcast %cst_22 : f32 to vector<1x1x32xf32>
    %58 = arith.addf %55, %57 : vector<1x1x32xf32>
    %59 = math.rsqrt %58 : vector<1x1x32xf32>
    %60 = vector.shape_cast %56 : vector<1x32xf32> to vector<1x1x32xf32>
    %61 = arith.mulf %60, %59 : vector<1x1x32xf32>
    %62 = vector.broadcast %46 : vector<1x1x32xf32> to vector<1x128x32xf32>
    %63 = arith.subf %42, %62 : vector<1x128x32xf32>
    %64 = vector.broadcast %61 : vector<1x1x32xf32> to vector<1x128x32xf32>
    %65 = arith.mulf %63, %64 : vector<1x128x32xf32>
    %c0_23 = arith.constant 0 : index
    %c0_24 = arith.constant 0 : index
    %66 = vector.load %arg7[%c0_23, %c0_24] : memref<1x32xf32, #tpu.memory_space<vmem>>, vector<1x32xf32>
    %67 = vector.shape_cast %66 : vector<1x32xf32> to vector<1x1x32xf32>
    %68 = vector.broadcast %67 : vector<1x1x32xf32> to vector<1x128x32xf32>
    %69 = arith.addf %65, %68 : vector<1x128x32xf32>
    %70 = vector.shape_cast %69 : vector<1x128x32xf32> to vector<128x32xf32>
    %71 = vector.extract_strided_slice %70 {offsets = [0, 0], sizes = [128, 16], strides = [1, 1]} : vector<128x32xf32> to vector<128x16xf32>
    %72 = vector.extract_strided_slice %70 {offsets = [0, 16], sizes = [128, 16], strides = [1, 1]} : vector<128x32xf32> to vector<128x16xf32>
    %73 = arith.negf %72 : vector<128x16xf32>
    %74 = math.exp %73 : vector<128x16xf32>
    %cst_25 = arith.constant 1.000000e+00 : f32
    %75 = vector.broadcast %cst_25 : f32 to vector<128x16xf32>
    %76 = arith.addf %75, %74 : vector<128x16xf32>
    %77 = arith.divf %75, %76 : vector<128x16xf32>
    %78 = arith.mulf %71, %77 : vector<128x16xf32>
    %79 = arith.addf %39, %78 : vector<128x16xf32>
    %cst_26 = arith.constant 0.707106769 : f32
    %80 = vector.broadcast %cst_26 : f32 to vector<128x16xf32>
    %81 = arith.mulf %79, %80 : vector<128x16xf32>
    %c0_27 = arith.constant 0 : index
    %c0_28 = arith.constant 0 : index
    %82 = vector.load %arg8[%c0_27, %c0_28] : memref<128x16xf32, #tpu.memory_space<vmem>>, vector<128x16xf32>
    tpu.vector_store %arg8[%c0_27, %c0_28], %81 {strides = array<i32>} : memref<128x16xf32, #tpu.memory_space<vmem>>, vector<128x16xf32>,
    return
  }
  func.func @transform_0(%arg0: i32) -> (i32, i32) {
    %c0_i32 = arith.constant 0 : i32
    %c0_i32_0 = arith.constant 0 : i32
    return %arg0, %c0_i32 : i32, i32
  }
  func.func @transform_1(%arg0: i32) -> (i32, i32) {
    %c0_i32 = arith.constant 0 : i32
    %c0_i32_0 = arith.constant 0 : i32
    %c0_i32_1 = arith.constant 0 : i32
    return %c0_i32, %c0_i32_0 : i32, i32
  }
  func.func @transform_2(%arg0: i32) -> (i32, i32) {
    %c0_i32 = arith.constant 0 : i32
    %c0_i32_0 = arith.constant 0 : i32
    %c0_i32_1 = arith.constant 0 : i32
    return %c0_i32, %c0_i32_0 : i32, i32
  }
  func.func @transform_3(%arg0: i32) -> (i32, i32) {
    %c0_i32 = arith.constant 0 : i32
    %c0_i32_0 = arith.constant 0 : i32
    %c0_i32_1 = arith.constant 0 : i32
    return %c0_i32, %c0_i32_0 : i32, i32
  }
  func.func @transform_4(%arg0: i32) -> (i32, i32) {
    %c0_i32 = arith.constant 0 : i32
    %c0_i32_0 = arith.constant 0 : i32
    %c0_i32_1 = arith.constant 0 : i32
    return %c0_i32, %c0_i32_0 : i32, i32
  }
  func.func @transform_5(%arg0: i32) -> (i32, i32) {
    %c0_i32 = arith.constant 0 : i32
    %c0_i32_0 = arith.constant 0 : i32
    %c0_i32_1 = arith.constant 0 : i32
    return %c0_i32, %c0_i32_0 : i32, i32
  }
  func.func @transform_6(%arg0: i32) -> (i32, i32) {
    %c0_i32 = arith.constant 0 : i32
    %c0_i32_0 = arith.constant 0 : i32
    %c0_i32_1 = arith.constant 0 : i32
    return %c0_i32, %c0_i32_0 : i32, i32
  }
  func.func @transform_7(%arg0: i32) -> (i32, i32) {
    %c0_i32 = arith.constant 0 : i32
    %c0_i32_0 = arith.constant 0 : i32
    return %arg0, %c0_i32 : i32, i32
  }
}

</mosaic_0001>

<bundles_post_ra>
// kernel: tpu_custom_call.1
= control target key start
LH: loop header
LB: loop body
LE: loop exit
PB: predicated region body
PF: predicated region fallthrough
CT: control target
= control target key end

     0   :  { %s2008_s24 = smov 0   ;;  %s3181_s0 = inlined_call_operand.vmem [shape: f32[256,32], index: 0, kind: input, shape index: {}]   ;;  %s3182_s1 = inlined_call_operand.vmem [shape: f32[32,32], index: 1, kind: input, shape index: {}]   ;;  %s3183_s2 = inlined_call_operand.vmem [shape: f32[1,32], index: 2, kind: input, shape index: {}]   ;;  %s3184_s3 = inlined_call_operand.vmem [shape: f32[1,32], index: 3, kind: input, shape index: {}]   ;;  %s3185_s4 = inlined_call_operand.vmem [shape: f32[16,32], index: 4, kind: input, shape index: {}]   ;;  %s3186_s5 = inlined_call_operand.vmem [shape: f32[1,32], index: 5, kind: input, shape index: {}]   ;;  %s3187_s6 = inlined_call_operand.vmem [shape: f32[1,32], index: 6, kind: input, shape index: {}]   ;;  %s3188_s7 = inlined_call_operand.vmem [shape: f32[256,16], index: 7, kind: output, shape index: {}]  }
   0x1 LB: > { %s1731_s25 = sadd.s32 4294967295, %s1964_s24   ;;  %p1735_p0 = scmp.ge.s32.totalorder %s1964_s24, 1  ;;  %s1964_s24 = sphi %s2008_s24, %s17_s24  }
   0x2   : > { %p238_p1 = scmp.lt.s32.totalorder %s1964_s24, 3 }
   0x4   : > { %p239_p2 = pnand %p1735_p0, %p238_p1 }
   0x6   : > { %242 = sbr.rel (%p239_p2) target bundleno = 962 (0x3c2), region = 48 }
   0xb   : > { %v301_v0 = vld [vmem:[%s3182_s1 + $0x18] sm:$0xff]  ;;  %v300_v1 = vld [vmem:[%s3182_s1 + $0x10] sm:$0xff]  ;;  %s1736_s30 = sshll.u32 %s1731_s25, 4  ;;  %v299_v2 = vld [vmem:[%s3182_s1 + $0x8] sm:$0xff]  ;;  %vm302_vm0 = vcmask 261120   ;;  %v1966_v52 = vmov 128.0  }
   0xc   : > { %363 = vmatpush.msra.mxu0 %v301_v0  ;;  %p271_p3 = scmp.lt.s32.totalorder %s1736_s30, 31  ;;  %1806 = vmatpush.msra.mxu2 %v301_v0  ;;  %v298_v3 = vld [vmem:[%s3182_s1] sm:$0xff]  ;;  %1824 = vrcp.f32 %v1966_v52  ;;  %s1967_s20 = smov 112  }
   0xe   : > { %364 = vmatpush.msra.mxu0 %v300_v1  ;;  %s3259_s30 = smov (!%p271_p3, %s1736_s30), 31  ;;  %1807 = vmatpush.msra.mxu2 %v300_v1 }
   0xf   : > { %s1737_s12 = sshll.u32 %s3259_s30, 3 }
  0x10   : > { %365 = vmatpush.msra.mxu0 %v299_v2  ;;  %1808 = vmatpush.msra.mxu2 %v299_v2  ;;  %s2036_s15 = scalar_lea.vmem %s3181_s0, %s1737_s12  ;;  %s3114_s10 = scalar_lea.vmem %s3188_s7, %s1737_s12 }
  0x11   : > { %v282_v4 = vld [vmem:[%s2036_s15] sm:$0xff]  ;;  %v283_v6 = vld [vmem:[%s2036_s15 + $0x8] sm:$0xff]  ;;  %v284_v8 = vld [vmem:[%s2036_s15 + $0x10] sm:$0xff] }
  0x12   : > { %366 = vmatpush.msra.mxu0 %v298_v3  ;;  %1809 = vmatpush.msra.mxu2 %v298_v3  ;;  %v290_v5 = vld [vmem:[%s2036_s15 + $0x40] sm:$0xff]  ;;  %v291_v7 = vld [vmem:[%s2036_s15 + $0x48] sm:$0xff]  ;;  %v292_v9 = vld [vmem:[%s2036_s15 + $0x50] sm:$0xff]  ;;  %v1825_v58 = vpop.eup %1824 }
  0x13   : > { %1740 = vmatmul.msk.f32.vlgmr.msra.gmra.mxu0 %vm302_vm0, %v282_v4  ;;  %1748 = vmatmul.msk.f32.vlgmr.msra.gmra.mxu2 %vm302_vm0, %v290_v5  ;;  %v285_v10 = vld [vmem:[%s2036_s15 + $0x18] sm:$0xff]  ;;  %v286_v12 = vld [vmem:[%s2036_s15 + $0x20] sm:$0xff]  ;;  %v287_v14 = vld [vmem:[%s2036_s15 + $0x28] sm:$0xff]  ;;  %v454_v0 = vmul.f32 128.0, %v1825_v58  ;;  %vm458_vm1 = vweird.f32 %v1825_v58 }
  0x14   : > { %v293_v11 = vld [vmem:[%s2036_s15 + $0x58] sm:$0xff]  ;;  %v294_v13 = vld [vmem:[%s2036_s15 + $0x60] sm:$0xff]  ;;  %v295_v15 = vld [vmem:[%s2036_s15 + $0x68] sm:$0xff] }
  0x15   : > { %v288_v16 = vld [vmem:[%s2036_s15 + $0x30] sm:$0xff]  ;;  %v289_v18 = vld [vmem:[%s2036_s15 + $0x38] sm:$0xff]  ;;  %v455_v5 = vsub.f32 1.0, %v454_v0 }
  0x16   : > { %v296_v17 = vld [vmem:[%s2036_s15 + $0x70] sm:$0xff]  ;;  %v297_v19 = vld [vmem:[%s2036_s15 + $0x78] sm:$0xff] }
  0x1b   : > { %1741 = vmatmul.msk.f32.gmra.mxu0 %vm302_vm0, %v283_v6  ;;  %1749 = vmatmul.msk.f32.gmra.mxu2 %vm302_vm0, %v291_v7 }
  0x23   : > { %1742 = vmatmul.msk.f32.gmra.mxu0 %vm302_vm0, %v284_v8  ;;  %1750 = vmatmul.msk.f32.gmra.mxu2 %vm302_vm0, %v292_v9  ;;  %v456_v8 = vmul.f32 %v1825_v58, %v455_v5 }
  0x2b   : > { %1743 = vmatmul.msk.f32.gmra.mxu0 %vm302_vm0, %v285_v10  ;;  %1751 = vmatmul.msk.f32.gmra.mxu2 %vm302_vm0, %v293_v11  ;;  %v457_v11 = vadd.f32 %v1825_v58, %v456_v8 }
  0x33   : > { %1744 = vmatmul.msk.f32.gmra.mxu0 %vm302_vm0, %v286_v12  ;;  %1752 = vmatmul.msk.f32.gmra.mxu2 %vm302_vm0, %v294_v13 }
  0x3b   : > { %1745 = vmatmul.msk.f32.gmra.mxu0 %vm302_vm0, %v287_v14  ;;  %1753 = vmatmul.msk.f32.gmra.mxu2 %vm302_vm0, %v295_v15  ;;  %v2113_v14 = vsel %vm458_vm1, %v1825_v58, %v457_v11 }
  0x43   : > { %1746 = vmatmul.msk.f32.gmra.mxu0 %vm302_vm0, %v288_v16  ;;  %1754 = vmatmul.msk.f32.gmra.mxu2 %vm302_vm0, %v296_v17 }
  0x4b   : > { %1747 = vmatmul.msk.f32.gmra.mxu0 %vm302_vm0, %v289_v18  ;;  %1755 = vmatmul.msk.f32.gmra.mxu2 %vm302_vm0, %v297_v19 }
  0x90   : > { %v2070_v20 = vpop.f32.mrf.mxu0 }
  0x91   : > { %v416_v32 = vsel %vm302_vm0, %v2070_v20, 0.0 }
  0x96   : > { %v2072_v21 = vpop.f32.mrf.mxu2 }
  0x97   : > { %v431_v50 = vsel %vm302_vm0, %v2072_v21, 0.0 }
  0x98   : > { %v371_v22 = vpop.f32.mrf.mxu0 }
  0x99   : > { %v417_v31 = vsel %vm302_vm0, %v371_v22, 0.0 }
  0x9a   : > { %v418_v34 = vadd.f32 %v417_v31, %v416_v32 }
  0x9e   : > { %v2074_v23 = vpop.f32.mrf.mxu2 }
  0x9f   : > { %v433_v53 = vsel %vm302_vm0, %v2074_v23, 0.0 }
  0xa0   : > { %v374_v24 = vpop.f32.mrf.mxu0 }
  0xa1   : > { %v419_v33 = vsel %vm302_vm0, %v374_v24, 0.0 }
  0xa2   : > { %v420_v36 = vadd.f32 %v419_v33, %v418_v34 }
  0xa6   : > { %v2076_v25 = vpop.f32.mrf.mxu2 }
  0xa7   : > { %v435_v55 = vsel %vm302_vm0, %v2076_v25, 0.0 }
  0xa8   : > { %v377_v26 = vpop.f32.mrf.mxu0 }
  0xa9   : > { %v421_v35 = vsel %vm302_vm0, %v377_v26, 0.0 }
  0xaa   : > { %v422_v40 = vadd.f32 %v421_v35, %v420_v36 }
  0xae   : > { %v2078_v27 = vpop.f32.mrf.mxu2 }
  0xaf   : > { %v437_v57 = vsel %vm302_vm0, %v2078_v27, 0.0 }
  0xb0   : > { %v380_v28 = vpop.f32.mrf.mxu0 }
  0xb1   : > { %v423_v39 = vsel %vm302_vm0, %v380_v28, 0.0 }
  0xb2   : > { %v424_v42 = vadd.f32 %v423_v39, %v422_v40 }
  0xb6   : > { %v2080_v29 = vpop.f32.mrf.mxu2 }
  0xb7   : > { %v439_v60 = vsel %vm302_vm0, %v2080_v29, 0.0 }
  0xb8   : > { %v383_v30 = vpop.f32.mrf.mxu0 }
  0xb9   : > { %v425_v41 = vsel %vm302_vm0, %v383_v30, 0.0 }
  0xba   : > { %v426_v44 = vadd.f32 %v425_v41, %v424_v42 }
  0xbe   : > { %v2087_v38 = vpop.f32.mrf.mxu2 }
  0xbf   : > { %v441_v63 = vsel %vm302_vm0, %v2087_v38, 0.0 }
  0xc0   : > { %v386_v37 = vpop.f32.mrf.mxu0 }
  0xc1   : > { %v427_v43 = vsel %vm302_vm0, %v386_v37, 0.0 }
  0xc2   : > { %v428_v45 = vadd.f32 %v427_v43, %v426_v44 }
  0xc6   : > { %v2093_v49 = vpop.f32.mrf.mxu2 }
  0xc7   : > { %v443_v2 = vsel %vm302_vm0, %v2093_v49, 0.0 }
  0xc8   : > { %v389_v46 = vpop.f32.mrf.mxu0 }
  0xc9   : > { %v429_v47 = vsel %vm302_vm0, %v389_v46, 0.0 }
  0xca   : > { %v430_v48 = vadd.f32 %v429_v47, %v428_v45 }
  0xcc   : > { %v432_v51 = vadd.f32 %v431_v50, %v430_v48 }
  0xce   : > { %v434_v54 = vadd.f32 %v433_v53, %v432_v51  ;;  %v2105_v62 = vpop.f32.mrf.mxu2 }
  0xcf   : > { %v445_v3 = vsel %vm302_vm0, %v2105_v62, 0.0 }
  0xd0   : > { %v436_v56 = vadd.f32 %v435_v55, %v434_v54 }
  0xd2   : > { %v438_v59 = vadd.f32 %v437_v57, %v436_v56 }
  0xd4   : > { %v440_v61 = vadd.f32 %v439_v60, %v438_v59 }
  0xd6   : > { %v442_v1 = vadd.f32 %v441_v63, %v440_v61 }
  0xd8   : > { %v444_v4 = vadd.f32 %v443_v2, %v442_v1 }
  0xda   : > { %v446_v6 = vadd.f32 %v445_v3, %v444_v4 }
  0xdc   : > { %v447_v7 = vrot.slane %v446_v6, 4 }
  0xde   : > { %v448_v9 = vadd.f32 %v447_v7, %v446_v6 }
  0xe0   : > { %v449_v10 = vrot.slane %v448_v9, 2 }
  0xe2   : > { %v450_v12 = vadd.f32 %v449_v10, %v448_v9 }
  0xe4   : > { %v451_v13 = vrot.slane %v450_v12, 1 }
  0xe6   : > { %v452_v15 = vadd.f32 %v451_v13, %v450_v12 }
  0xe8   : > { %v460_v16 = vmul.f32 %v2113_v14, %v452_v15 }
  0xea   : > { %v2117_v17 = vsub.f32 %v2070_v20, %v460_v16  ;;  %v2119_v18 = vsub.f32 %v371_v22, %v460_v16  ;;  %v2121_v19 = vsub.f32 %v374_v24, %v460_v16  ;;  %v2123_v31 = vsub.f32 %v377_v26, %v460_v16 }
  0xeb   : > { %v2129_v34 = vsub.f32 %v380_v28, %v460_v16  ;;  %v2133_v36 = vsub.f32 %v383_v30, %v460_v16  ;;  %v2139_v39 = vsub.f32 %v386_v37, %v460_v16  ;;  %v2144_v42 = vsub.f32 %v389_v46, %v460_v16 }
  0xec   : > { %v477_v32 = vmul.f32 %v2117_v17, %v2117_v17  ;;  %v478_v33 = vmul.f32 %v2119_v18, %v2119_v18  ;;  %v479_v35 = vmul.f32 %v2121_v19, %v2121_v19  ;;  %v480_v20 = vmul.f32 %v2123_v31, %v2123_v31 }
  0xed   : > { %v481_v40 = vmul.f32 %v2129_v34, %v2129_v34  ;;  %v482_v30 = vmul.f32 %v2133_v36, %v2133_v36  ;;  %v2150_v45 = vsub.f32 %v2072_v21, %v460_v16  ;;  %v483_v37 = vmul.f32 %v2139_v39, %v2139_v39 }
  0xee   : > { %v493_v22 = vsel %vm302_vm0, %v477_v32, 0.0  ;;  %v494_v24 = vsel %vm302_vm0, %v478_v33, 0.0  ;;  %v496_v28 = vsel %vm302_vm0, %v479_v35, 0.0  ;;  %v498_v43 = vsel %vm302_vm0, %v480_v20, 0.0 }
  0xef   : > { %v495_v26 = vadd.f32 %v494_v24, %v493_v22  ;;  %v500_v47 = vsel %vm302_vm0, %v481_v40, 0.0  ;;  %v470_v50 = vsub.f32 %v2074_v23, %v460_v16  ;;  %v484_v46 = vmul.f32 %v2144_v42, %v2144_v42 }
  0xf0   : > { %v502_v51 = vsel %vm302_vm0, %v482_v30, 0.0  ;;  %v2160_v53 = vsub.f32 %v2076_v25, %v460_v16  ;;  %v485_v21 = vmul.f32 %v2150_v45, %v2150_v45  ;;  %v504_v54 = vsel %vm302_vm0, %v483_v37, 0.0  ;;  %v531_v37 = vld [vmem:[%s3183_s2] sm:$0x1] }
  0xf1   : > { %v497_v41 = vadd.f32 %v496_v28, %v495_v26  ;;  %v472_v56 = vsub.f32 %v2078_v27, %v460_v16  ;;  %v486_v57 = vmul.f32 %v470_v50, %v470_v50  ;;  %v506_v23 = vsel %vm302_vm0, %v484_v46, 0.0 }
  0xf2   : > { %v2168_v59 = vsub.f32 %v2080_v29, %v460_v16  ;;  %v487_v60 = vmul.f32 %v2160_v53, %v2160_v53  ;;  %v508_v25 = vsel %vm302_vm0, %v485_v21, 0.0  ;;  %v2174_v63 = vsub.f32 %v2087_v38, %v460_v16 }
  0xf3   : > { %v499_v44 = vadd.f32 %v498_v43, %v497_v41  ;;  %v488_v0 = vmul.f32 %v472_v56, %v472_v56  ;;  %v510_v1 = vsel %vm302_vm0, %v486_v57, 0.0  ;;  %v2178_v2 = vsub.f32 %v2093_v49, %v460_v16 }
  0xf4   : > { %v489_v29 = vmul.f32 %v2168_v59, %v2168_v59  ;;  %v512_v3 = vsel %vm302_vm0, %v487_v60, 0.0  ;;  %v476_v5 = vsub.f32 %v2105_v62, %v460_v16  ;;  %v490_v6 = vmul.f32 %v2174_v63, %v2174_v63 }
  0xf5   : > { %v501_v48 = vadd.f32 %v500_v47, %v499_v44  ;;  %v514_v38 = vsel %vm302_vm0, %v488_v0, 0.0  ;;  %v491_v8 = vmul.f32 %v2178_v2, %v2178_v2 }
  0xf6   : > { %v516_v49 = vsel %vm302_vm0, %v489_v29, 0.0  ;;  %v492_v10 = vmul.f32 %v476_v5, %v476_v5  ;;  %v518_v11 = vsel %vm302_vm0, %v490_v6, 0.0 }
  0xf7   : > { %v503_v52 = vadd.f32 %v502_v51, %v501_v48  ;;  %v520_v13 = vsel %vm302_vm0, %v491_v8, 0.0 }
  0xf8   : > { %v522_v62 = vsel %vm302_vm0, %v492_v10, 0.0 }
  0xf9   : > { %v505_v55 = vadd.f32 %v504_v54, %v503_v52  ;;  %v2202_v52 = vld [vmem:[%s3184_s3] ss:$0 sm:$0xff] }
  0xfb   : > { %v507_v58 = vadd.f32 %v506_v23, %v505_v55 }
  0xfd   : > { %v509_v61 = vadd.f32 %v508_v25, %v507_v58 }
  0xff   : > { %v511_v27 = vadd.f32 %v510_v1, %v509_v61 }
 0x101   : > { %v513_v4 = vadd.f32 %v512_v3, %v511_v27 }
 0x103   : > { %v515_v7 = vadd.f32 %v514_v38, %v513_v4 }
 0x105   : > { %v517_v9 = vadd.f32 %v516_v49, %v515_v7 }
 0x107   : > { %v519_v12 = vadd.f32 %v518_v11, %v517_v9 }
 0x109   : > { %v521_v15 = vadd.f32 %v520_v13, %v519_v12 }
 0x10b   : > { %v523_v16 = vadd.f32 %v522_v62, %v521_v15 }
 0x10d   : > { %v524_v32 = vrot.slane %v523_v16, 4 }
 0x10f   : > { %v525_v33 = vadd.f32 %v524_v32, %v523_v16 }
 0x111   : > { %v526_v35 = vrot.slane %v525_v33, 2 }
 0x113   : > { %v527_v20 = vadd.f32 %v526_v35, %v525_v33 }
 0x115   : > { %v528_v22 = vrot.slane %v527_v20, 1 }
 0x117   : > { %v529_v24 = vadd.f32 %v528_v22, %v527_v20 }
 0x119   : > { %v530_v26 = vmul.f32 %v529_v24, %v2113_v14 }
 0x11b   : > { %v532_v40 = vadd.f32 1e-05, %v530_v26 }
 0x11d   : > { %1826 = vrsqrt.f32 %v532_v40  ;;  %vm539_vm3 = vweird.f32 %v532_v40 }
 0x123   : > { %v1827_v28 = vpop.eup %1826 }
 0x124   : > { %v534_v41 = vmul.f32 %v1827_v28, %v532_v40  ;;  %vm540_vm2 = vweird.f32 %v1827_v28 }
 0x125   : > { %vm541_vm4 = vmor %vm539_vm3, %vm540_vm2 }
 0x126   : > { %v535_v30 = vmul.f32 %v1827_v28, %v534_v41 }
 0x128   : > { %v536_v43 = vmul.f32 0.5, %v535_v30 }
 0x12a   : > { %v537_v44 = vsub.f32 1.5, %v536_v43 }
 0x12c   : > { %v538_v47 = vmul.f32 %v1827_v28, %v537_v44 }
 0x12e   : > { %v542_v48 = vsel %vm541_vm4, %v1827_v28, %v538_v47 }
 0x12f   : > { %v543_v46 = vmul.f32 %v542_v48, %v531_v37 }
 0x131   : > { %v2197_v51 = vperm.slane %v543_v46, 0 }
 0x133   : > { %v562_v21 = vmul.f32 %v2197_v51, %v476_v5  ;;  %v556_v54 = vmul.f32 %v2197_v51, %v470_v50  ;;  %v549_v55 = vmul.f32 %v2197_v51, %v2121_v19  ;;  %v547_v57 = vmul.f32 %v2197_v51, %v2117_v17 }
 0x134   : > { %v551_v23 = vmul.f32 %v2197_v51, %v2129_v34  ;;  %v558_v58 = vmul.f32 %v2197_v51, %v472_v56  ;;  %v550_v17 = vmul.f32 %v2197_v51, %v2123_v31  ;;  %v548_v34 = vmul.f32 %v2197_v51, %v2119_v18 }
 0x135   : > { %v2214_v60 = vadd.f32 %v2202_v52, %v562_v21  ;;  %v2217_v25 = vadd.f32 %v2202_v52, %v556_v54  ;;  %v2220_v61 = vadd.f32 %v2202_v52, %v549_v55  ;;  %v2223_v50 = vadd.f32 %v2202_v52, %v547_v57 }
 0x136   : > { %v2226_v19 = vadd.f32 %v2202_v52, %v551_v23  ;;  %v2237_v29 = vadd.f32 %v2202_v52, %v550_v17  ;;  %v2241_v4 = vadd.f32 %v2202_v52, %v548_v34  ;;  %v552_v18 = vmul.f32 %v2197_v51, %v2133_v36 }
 0x137   : > { %v1771_v56 = vmul.f32 -1.442695, %v2214_v60  ;;  %v1765_v0 = vmul.f32 -1.442695, %v2217_v25  ;;  %v1758_v1 = vmul.f32 -1.442695, %v2220_v61  ;;  %v2247_v5 = vadd.f32 %v2202_v52, %v558_v58 }
 0x138   : > { %v1756_v27 = vmul.f32 -1.442695, %v2223_v50  ;;  %v1760_v3 = vmul.f32 -1.442695, %v2226_v19  ;;  %v1759_v31 = vmul.f32 -1.442695, %v2237_v29  ;;  %v2251_v38 = vadd.f32 %v2202_v52, %v552_v18 }
 0x139   : > { %1828 = vpow2.f32 %v1771_v56  ;;  %v1757_v6 = vmul.f32 -1.442695, %v2241_v4  ;;  %v559_v7 = vmul.f32 %v2197_v51, %v2168_v59  ;;  %v1767_v36 = vmul.f32 -1.442695, %v2247_v5 }
 0x13a   : > { %1830 = vpow2.f32 %v1765_v0  ;;  %v557_v49 = vmul.f32 %v2197_v51, %v2160_v53  ;;  %v560_v10 = vmul.f32 %v2197_v51, %v2174_v63  ;;  %v554_v11 = vmul.f32 %v2197_v51, %v2144_v42 }
 0x13b   : > { %1832 = vpow2.f32 %v1758_v1  ;;  %v553_v12 = vmul.f32 %v2197_v51, %v2139_v39  ;;  %v561_v59 = vmul.f32 %v2197_v51, %v2178_v2  ;;  %v1761_v62 = vmul.f32 -1.442695, %v2251_v38 }
 0x13c   : > { %1834 = vpow2.f32 %v1756_v27  ;;  %v2270_v16 = vadd.f32 %v2202_v52, %v559_v7  ;;  %v2278_v39 = vadd.f32 %v2202_v52, %v557_v49  ;;  %v2281_v33 = vadd.f32 %v2202_v52, %v560_v10 }
 0x13d   : > { %1836 = vpow2.f32 %v1760_v3  ;;  %v2285_v35 = vadd.f32 %v2202_v52, %v554_v11  ;;  %v2288_v20 = vadd.f32 %v2202_v52, %v553_v12  ;;  %v555_v40 = vmul.f32 %v2197_v51, %v2150_v45 }
 0x13e   : > { %1838 = vpow2.f32 %v1759_v31  ;;  %v2297_v28 = vadd.f32 %v2202_v52, %v561_v59  ;;  %v2303_v30 = vmul.f32 -1.442695, %v2270_v16  ;;  %v1766_v37 = vmul.f32 -1.442695, %v2278_v39 }
 0x13f   : > { %v1829_v8 = vpop.eup %1828  ;;  %1840 = vpow2.f32 %v1757_v6  ;;  %v2316_v21 = vmul.f32 -1.442695, %v2285_v35  ;;  %v2319_v54 = vmul.f32 -1.442695, %v2288_v20  ;;  %v2322_v55 = vadd.f32 %v2202_v52, %v555_v40 }
 0x140   : > { %v1831_v9 = vpop.eup %1830  ;;  %v2272_v32 = vadd.f32 1.0, %v1829_v8  ;;  %1842 = vpow2.f32 %v1767_v36 }
 0x141   : > { %v1833_v13 = vpop.eup %1832  ;;  %v2266_v15 = vadd.f32 1.0, %v1831_v9 }
 0x142   : > { %v1835_v53 = vpop.eup %1834  ;;  %v2274_v63 = vadd.f32 1.0, %v1833_v13 }
 0x143   : > { %v1837_v42 = vpop.eup %1836  ;;  %1844 = vrcp.f32 %v2266_v15  ;;  %v2290_v24 = vadd.f32 1.0, %v1835_v53  ;;  %v791_v43 = vand.u32 2147483647, %v2266_v15  ;;  %v793_v44 = vand.u32 2147483648, %v2266_v15 }
 0x144   : > { %v1839_v2 = vpop.eup %1838  ;;  %1846 = vrcp.f32 %v2274_v63  ;;  %v2292_v26 = vadd.f32 1.0, %v1837_v42  ;;  %v686_v45 = vand.u32 2147483647, %v2274_v63  ;;  %v688_v48 = vand.u32 2147483648, %v2274_v63 }
 0x145   : > { %v1841_v22 = vpop.eup %1840  ;;  %1848 = vpow2.f32 %v1761_v62  ;;  %v2300_v41 = vadd.f32 1.0, %v1839_v2  ;;  %vm787_vm5 = vweird.f32 %v2266_v15  ;;  %vm682_vm6 = vweird.f32 %v2274_v63 }
 0x146   : > { %1850 = vrcp.f32 %v2272_v32  ;;  %v1843_v47 = vpop.eup %1842  ;;  %v2312_v46 = vadd.f32 1.0, %v1841_v22  ;;  %v656_v58 = vand.u32 2147483647, %v2290_v24  ;;  %vm2328_vm7 = vcmp.eq.f32.partialorder %v791_v43, 8.507059e+37 }
 0x147   : > { %1852 = vrcp.f32 %v2290_v24  ;;  %v794_v56 = vor.u32 1.1754944e-38, %v793_v44  ;;  %v658_v52 = vand.u32 2147483648, %v2290_v24  ;;  %vm2336_vm8 = vcmp.eq.f32.partialorder %v686_v45, 8.507059e+37 }
 0x148   : > { %1854 = vrcp.f32 %v2292_v26  ;;  %v689_v18 = vor.u32 1.1754944e-38, %v688_v48  ;;  %vm652_vm9 = vweird.f32 %v2290_v24  ;;  %v716_v7 = vand.u32 2147483647, %v2292_v26 }
 0x149   : > { %v1845_v51 = vpop.eup %1844  ;;  %1856 = vrcp.f32 %v2300_v41  ;;  %v718_v36 = vand.u32 2147483648, %v2292_v26  ;;  %vm2347_vm11 = vcmp.eq.f32.partialorder %v656_v58, 8.507059e+37  ;;  %vm712_vm12 = vweird.f32 %v2292_v26 }
 0x14a   : > { %v1847_v57 = vpop.eup %1846  ;;  %v783_v23 = vmul.f32 %v1845_v51, %v2266_v15  ;;  %1858 = vrcp.f32 %v2312_v46  ;;  %vm788_vm10 = vweird.f32 %v1845_v51  ;;  %v659_v13 = vor.u32 1.1754944e-38, %v658_v52 }
 0x14b   : > { %v1849_v17 = vpop.eup %1848  ;;  %v678_v0 = vmul.f32 %v1847_v57, %v2274_v63  ;;  %vm683_vm13 = vweird.f32 %v1847_v57  ;;  %vm789_vm15 = vmor %vm787_vm5, %vm788_vm10  ;;  %v2360_v40 = vadd.f32 1.0, %v1843_v47  ;;  %1860 = vpow2.f32 %v1766_v37 }
 0x14c   : > { %v2334_v1 = vpop.eup %1850  ;;  %v784_v27 = vsub.f32 1.0, %v783_v23  ;;  %v2362_v43 = vadd.f32 1.0, %v1849_v17  ;;  %vm684_vm1 = vmor %vm682_vm6, %vm683_vm13  ;;  %vm697_vm5 = vweird.f32 %v2300_v41  ;;  %v703_v52 = vand.u32 2147483648, %v2300_v41 }
 0x14d   : > { %v1853_v31 = vpop.eup %1852  ;;  %v679_v6 = vsub.f32 1.0, %v678_v0  ;;  %1862 = vrcp.f32 %v2360_v40  ;;  %v701_v3 = vand.u32 2147483647, %v2300_v41  ;;  %v671_v10 = vand.u32 2147483647, %v2312_v46 }
 0x14e   : > { %v2344_v8 = vpop.eup %1854  ;;  %v785_v49 = vmul.f32 %v1845_v51, %v784_v27  ;;  %v648_v9 = vmul.f32 %v1853_v31, %v2290_v24  ;;  %vm653_vm14 = vweird.f32 %v1853_v31  ;;  %1864 = vrcp.f32 %v2362_v43 }
 0x14f   : > { %v2352_v11 = vpop.eup %1856  ;;  %v680_v12 = vmul.f32 %v1847_v57, %v679_v6  ;;  %v708_v59 = vmul.f32 %v2344_v8, %v2292_v26  ;;  %vm713_vm2 = vweird.f32 %v2344_v8  ;;  %vm654_vm3 = vmor %vm652_vm9, %vm653_vm14  ;;  %vm667_vm10 = vweird.f32 %v2312_v46 }
 0x150   : > { %v786_v62 = vadd.f32 %v1845_v51, %v785_v49  ;;  %v649_v53 = vsub.f32 1.0, %v648_v9  ;;  %v693_v42 = vmul.f32 %v2352_v11, %v2300_v41  ;;  %v2364_v44 = vpop.eup %1858  ;;  %vm698_vm4 = vweird.f32 %v2352_v11  ;;  %vm2392_vm6 = vmor %vm712_vm12, %vm713_vm2 }
 0x151   : > { %v681_v2 = vadd.f32 %v1847_v57, %v680_v12  ;;  %v709_v22 = vsub.f32 1.0, %v708_v59  ;;  %v663_v47 = vmul.f32 %v2364_v44, %v2312_v46  ;;  %v719_v49 = vor.u32 1.1754944e-38, %v718_v36 }
 0x152   : > { %v790_v45 = vsel %vm789_vm15, %v1845_v51, %v786_v62  ;;  %v650_v48 = vmul.f32 %v1853_v31, %v649_v53  ;;  %v694_v23 = vsub.f32 1.0, %v693_v42  ;;  %vm668_vm9 = vweird.f32 %v2364_v44 }
 0x153   : > { %v795_v58 = vsel %vm2328_vm7, %v794_v56, %v790_v45  ;;  %v685_v15 = vsel %vm684_vm1, %v1847_v57, %v681_v2  ;;  %v710_v0 = vmul.f32 %v2344_v8, %v709_v22  ;;  %v664_v17 = vsub.f32 1.0, %v663_v47  ;;  %vm2421_vm12 = vmor %vm667_vm10, %vm668_vm9 }
 0x154   : > { %921 = vrot.lane.b32.xlu2 %v795_v58, %s1967_s20  ;;  %v690_v51 = vsel %vm2336_vm8, %v689_v18, %v685_v15  ;;  %v651_v63 = vadd.f32 %v1853_v31, %v650_v48  ;;  %v695_v37 = vmul.f32 %v2352_v11, %v694_v23  ;;  %vm717_vm7 = vcmp.eq.f32.partialorder %v716_v7, 8.507059e+37  ;;  %vm2405_vm8 = vmor %vm697_vm5, %vm698_vm4 }
 0x155   : > { %907 = vrot.lane.b32.xlu1 %v690_v51, %s1967_s20  ;;  %v711_v57 = vadd.f32 %v2344_v8, %v710_v0  ;;  %v665_v18 = vmul.f32 %v2364_v44, %v664_v17  ;;  %v704_v7 = vor.u32 1.1754944e-38, %v703_v52  ;;  %1866 = vpow2.f32 %v2316_v21 }
 0x156   : > { %v655_v34 = vsel %vm654_vm3, %v1853_v31, %v651_v63  ;;  %v696_v56 = vadd.f32 %v2352_v11, %v695_v37  ;;  %v1861_v31 = vpop.eup %1860  ;;  %1868 = vpow2.f32 %v2303_v30  ;;  %v1764_v53 = vmul.f32 -1.442695, %v2322_v55 }
 0x157   : > { %v660_v27 = vsel %vm2347_vm11, %v659_v13, %v655_v34  ;;  %v715_v6 = vsel %vm2392_vm6, %v2344_v8, %v711_v57  ;;  %v666_v9 = vadd.f32 %v2364_v44, %v665_v18  ;;  %v673_v8 = vand.u32 2147483648, %v2312_v46  ;;  %v1863_v12 = vpop.eup %1862 }
 0x158   : > { %903 = vrot.lane.b32.xlu0 %v660_v27, %s1967_s20  ;;  %v700_v41 = vsel %vm2405_vm8, %v2352_v11, %v696_v56  ;;  %v2417_v36 = vadd.f32 1.0, %v1861_v31  ;;  %v1770_v13 = vmul.f32 -1.442695, %v2297_v28  ;;  %v720_v59 = vsel %vm717_vm7, %v719_v49, %v715_v6  ;;  %v1865_v42 = vpop.eup %1864 }
 0x159   : > { %vm702_vm11 = vcmp.eq.f32.partialorder %v701_v3, 8.507059e+37  ;;  %v670_v46 = vsel %vm2421_vm12, %v2364_v44, %v666_v9  ;;  %v813_v21 = vmul.f32 %v1863_v12, %v2360_v40  ;;  %vm672_vm13 = vcmp.eq.f32.partialorder %v671_v10, 8.507059e+37 }
 0x15a   : > { %v705_v62 = vsel %vm702_vm11, %v704_v7, %v700_v41  ;;  %v674_v2 = vor.u32 1.1754944e-38, %v673_v8  ;;  %vm817_vm14 = vweird.f32 %v2360_v40  ;;  %1870 = vrcp.f32 %v2417_v36 }
 0x15b   : > { %v814_v30 = vsub.f32 1.0, %v813_v21  ;;  %v723_v22 = vmul.f32 %v1865_v42, %v2362_v43  ;;  %1872 = vpow2.f32 %v2319_v54  ;;  %v1769_v44 = vmul.f32 -1.442695, %v2281_v33  ;;  %v1867_v58 = vpop.eup %1866 }
 0x15c   : > { %911 = vrot.lane.b32.xlu2 %v720_v59, %s1967_s20  ;;  %v675_v45 = vsel %vm672_vm13, %v674_v2, %v670_v46  ;;  %v821_v48 = vand.u32 2147483647, %v2360_v40  ;;  %v823_v23 = vand.u32 2147483648, %v2360_v40  ;;  %1874 = vpow2.f32 %v1770_v13  ;;  %v1869_v51 = vpop.eup %1868 }
 0x15d   : > { %909 = vrot.lane.b32.xlu1 %v705_v62, %s1967_s20  ;;  %v815_v15 = vmul.f32 %v1863_v12, %v814_v30  ;;  %vm818_vm15 = vweird.f32 %v1863_v12  ;;  %v724_v0 = vsub.f32 1.0, %v723_v22  ;;  %v731_v47 = vand.u32 2147483647, %v2362_v43 }
 0x15e   : > { %vm728_vm1 = vweird.f32 %v1865_v42  ;;  %v733_v54 = vand.u32 2147483648, %v2362_v43  ;;  %v2443_v63 = vadd.f32 1.0, %v1867_v58  ;;  %1876 = vpow2.f32 %v1764_v53  ;;  %vm819_vm2 = vmor %vm817_vm14, %vm818_vm15  ;;  %v968_v53 = vld [vmem:[%s3185_s4 + $0x8] sm:$0xff] }
 0x15f   : > { %v816_v37 = vadd.f32 %v1863_v12, %v815_v15  ;;  %v725_v57 = vmul.f32 %v1865_v42, %v724_v0  ;;  %v2445_v17 = vadd.f32 1.0, %v1869_v51  ;;  %1878 = vpow2.f32 %v1769_v44  ;;  %1810 = vmatpush.msra.mxu3 %v968_v53  ;;  %1032 = vmatpush.msra.mxu1 %v968_v53 }
 0x160   : > { %905 = vrot.lane.b32.xlu0 %v675_v45, %s1967_s20  ;;  %v1871_v34 = vpop.eup %1870  ;;  %vm822_vm3 = vcmp.eq.f32.partialorder %v821_v48, 8.507059e+37  ;;  %v824_v56 = vor.u32 1.1754944e-38, %v823_v23  ;;  %1880 = vrcp.f32 %v2443_v63  ;;  %vm727_vm4 = vweird.f32 %v2362_v43 }
 0x161   : > { %v1873_v52 = vpop.eup %1872  ;;  %v820_v27 = vsel %vm819_vm2, %v1863_v12, %v816_v37  ;;  %v726_v24 = vadd.f32 %v1865_v42, %v725_v57  ;;  %v798_v3 = vmul.f32 %v1871_v34, %v2417_v36  ;;  %vm729_vm5 = vmor %vm727_vm4, %vm728_vm1  ;;  %v734_v6 = vor.u32 1.1754944e-38, %v733_v54 }
 0x162   : > { %v1875_v18 = vpop.eup %1874  ;;  %v825_v31 = vsel %vm822_vm3, %v824_v56, %v820_v27  ;;  %1882 = vrcp.f32 %v2445_v17  ;;  %vm732_vm6 = vcmp.eq.f32.partialorder %v731_v47, 8.507059e+37  ;;  %v808_v26 = vand.u32 2147483648, %v2417_v36 }
 0x163   : > { %v730_v40 = vsel %vm729_vm5, %v1865_v42, %v726_v24  ;;  %v799_v49 = vsub.f32 1.0, %v798_v3  ;;  %v2456_v10 = vadd.f32 1.0, %v1873_v52  ;;  %v2458_v43 = vadd.f32 1.0, %v1875_v18 }
 0x164   : > { %925 = vrot.lane.b32.xlu2 %v825_v31, %s1967_s20  ;;  %v1877_v41 = vpop.eup %1876  ;;  %v735_v9 = vsel %vm732_vm6, %v734_v6, %v730_v40  ;;  %vm803_vm7 = vweird.f32 %v1871_v34  ;;  %v806_v12 = vand.u32 2147483647, %v2417_v36  ;;  %vm802_vm8 = vweird.f32 %v2417_v36 }
 0x165   : > { %v1879_v8 = vpop.eup %1878  ;;  %913 = vrot.lane.b32.xlu1 %v735_v9, %s1967_s20  ;;  %v800_v7 = vmul.f32 %v1871_v34, %v799_v49  ;;  %1884 = vrcp.f32 %v2456_v10  ;;  %v2466_v59 = vmul.f32 %v2334_v1, %v2272_v32  ;;  %v809_v62 = vor.u32 1.1754944e-38, %v808_v26  ;;  %vm804_vm9 = vmor %vm802_vm8, %vm803_vm7 }
 0x166   : > { %v1881_v13 = vpop.eup %1880  ;;  %v2469_v21 = vadd.f32 1.0, %v1877_v41  ;;  %v761_v36 = vand.u32 2147483647, %v2443_v63  ;;  %v763_v2 = vand.u32 2147483648, %v2443_v63  ;;  %1886 = vrcp.f32 %v2458_v43 }
 0x167   : > { %v801_v11 = vadd.f32 %v1871_v34, %v800_v7  ;;  %v753_v46 = vmul.f32 %v1881_v13, %v2443_v63  ;;  %v2477_v30 = vadd.f32 1.0, %v1879_v8  ;;  %vm807_vm10 = vcmp.eq.f32.partialorder %v806_v12, 8.507059e+37 }
 0x168   : > { %v1883_v42 = vpop.eup %1882  ;;  %v836_v23 = vand.u32 2147483647, %v2445_v17  ;;  %v838_v58 = vand.u32 2147483648, %v2445_v17  ;;  %v874_v15 = vsub.f32 1.0, %v2466_v59  ;;  %vm758_vm11 = vweird.f32 %v1881_v13 }
 0x169   : > { %v805_v22 = vsel %vm804_vm9, %v1871_v34, %v801_v11  ;;  %v754_v44 = vsub.f32 1.0, %v753_v46  ;;  %v828_v45 = vmul.f32 %v1883_v42, %v2445_v17  ;;  %1888 = vrcp.f32 %v2469_v21 }
 0x16a   : > { %v810_v48 = vsel %vm807_vm10, %v809_v62, %v805_v22  ;;  %vm757_vm12 = vweird.f32 %v2443_v63  ;;  %vm2486_vm13 = vcmp.eq.f32.partialorder %v761_v36, 8.507059e+37  ;;  %v764_v37 = vor.u32 1.1754944e-38, %v763_v2 }
 0x16b   : > { %923 = vrot.lane.b32.xlu0 %v810_v48, %s1967_s20  ;;  %v755_v0 = vmul.f32 %v1881_v13, %v754_v44  ;;  %v829_v47 = vsub.f32 1.0, %v828_v45  ;;  %v1885_v51 = vpop.eup %1884  ;;  %1890 = vrcp.f32 %v2477_v30  ;;  %vm833_vm14 = vweird.f32 %v1883_v42  ;;  %vm759_vm15 = vmor %vm757_vm12, %vm758_vm11 }
 0x16c   : > { %v738_v56 = vmul.f32 %v1885_v51, %v2456_v10  ;;  %v1887_v52 = vpop.eup %1886  ;;  %vm832_vm1 = vweird.f32 %v2445_v17  ;;  %vm2493_vm2 = vcmp.eq.f32.partialorder %v836_v23, 8.507059e+37  ;;  %v839_v63 = vor.u32 1.1754944e-38, %v838_v58 }
 0x16d   : > { %v756_v57 = vadd.f32 %v1881_v13, %v755_v0  ;;  %v830_v34 = vmul.f32 %v1883_v42, %v829_v47  ;;  %v746_v24 = vand.u32 2147483647, %v2456_v10  ;;  %v858_v6 = vmul.f32 %v1887_v52, %v2458_v43  ;;  %vm834_vm3 = vmor %vm832_vm1, %vm833_vm14 }
 0x16e   : > { %v739_v31 = vsub.f32 1.0, %v738_v56  ;;  %vm742_vm4 = vweird.f32 %v2456_v10  ;;  %v748_v17 = vand.u32 2147483648, %v2456_v10  ;;  %v868_v49 = vand.u32 2147483648, %v2458_v43 }
 0x16f   : > { %v760_v3 = vsel %vm759_vm15, %v1881_v13, %v756_v57  ;;  %v831_v18 = vadd.f32 %v1883_v42, %v830_v34  ;;  %v1889_v26 = vpop.eup %1888  ;;  %vm743_vm5 = vweird.f32 %v1885_v51  ;;  %v859_v8 = vsub.f32 1.0, %v858_v6 }
 0x170   : > { %v765_v40 = vsel %vm2486_vm13, %v764_v37, %v760_v3  ;;  %v740_v9 = vmul.f32 %v1885_v51, %v739_v31  ;;  %vm2507_vm6 = vcmp.eq.f32.partialorder %v746_v24, 8.507059e+37  ;;  %v866_v11 = vand.u32 2147483647, %v2458_v43  ;;  %vm744_vm8 = vmor %vm742_vm4, %vm743_vm5 }
 0x171   : > { %917 = vrot.lane.b32.xlu2 %v765_v40, %s1967_s20  ;;  %v835_v41 = vsel %vm834_vm3, %v1883_v42, %v831_v18  ;;  %v1891_v7 = vpop.eup %1890  ;;  %v768_v62 = vmul.f32 %v1889_v26, %v2469_v21  ;;  %v860_v53 = vmul.f32 %v1887_v52, %v859_v8  ;;  %vm863_vm7 = vweird.f32 %v1887_v52  ;;  %v967_v40 = vld [vmem:[%s3185_s4] sm:$0xff] }
 0x172   : > { %v840_v12 = vsel %vm2493_vm2, %v839_v63, %v835_v41  ;;  %v741_v46 = vadd.f32 %v1885_v51, %v740_v9  ;;  %v843_v42 = vmul.f32 %v1891_v7, %v2477_v30  ;;  %v749_v36 = vor.u32 1.1754944e-38, %v748_v17  ;;  %1811 = vmatpush.msra.mxu3 %v967_v40  ;;  %1033 = vmatpush.msra.mxu1 %v967_v40 }
 0x173   : > { %927 = vrot.lane.b32.xlu1 %v840_v12, %s1967_s20  ;;  %vm862_vm9 = vweird.f32 %v2458_v43  ;;  %v869_v2 = vor.u32 1.1754944e-38, %v868_v49  ;;  %v769_v22 = vsub.f32 1.0, %v768_v62  ;;  %v861_v45 = vadd.f32 %v1887_v52, %v860_v53 }
 0x174   : > { %v745_v44 = vsel %vm744_vm8, %v1885_v51, %v741_v46  ;;  %v778_v48 = vand.u32 2147483648, %v2469_v21  ;;  %v844_v23 = vsub.f32 1.0, %v843_v42  ;;  %vm864_vm10 = vmor %vm862_vm9, %vm863_vm7  ;;  %vm773_vm11 = vweird.f32 %v1889_v26 }
 0x175   : > { %v750_v58 = vsel %vm2507_vm6, %v749_v36, %v745_v44  ;;  %v770_v0 = vmul.f32 %v1889_v26, %v769_v22  ;;  %v776_v47 = vand.u32 2147483647, %v2469_v21  ;;  %v865_v10 = vsel %vm864_vm10, %v1887_v52, %v861_v45 }
 0x176   : > { %915 = vrot.lane.b32.xlu0 %v750_v58, %s1967_s20  ;;  %vm867_vm12 = vcmp.eq.f32.partialorder %v866_v11, 8.507059e+37  ;;  %v845_v43 = vmul.f32 %v1891_v7, %v844_v23  ;;  %vm848_vm13 = vweird.f32 %v1891_v7  ;;  %vm772_vm14 = vweird.f32 %v2469_v21 }
 0x177   : > { %v870_v54 = vsel %vm867_vm12, %v869_v2, %v865_v10  ;;  %v771_v51 = vadd.f32 %v1889_v26, %v770_v0  ;;  %v853_v37 = vand.u32 2147483648, %v2477_v30  ;;  %vm774_vm15 = vmor %vm772_vm14, %vm773_vm11  ;;  %v779_v57 = vor.u32 1.1754944e-38, %v778_v48 }
 0x178   : > { %v846_v34 = vadd.f32 %v1891_v7, %v845_v43  ;;  %vm847_vm1 = vweird.f32 %v2477_v30  ;;  %v851_v56 = vand.u32 2147483647, %v2477_v30  ;;  %vm777_vm2 = vcmp.eq.f32.partialorder %v776_v47, 8.507059e+37 }
 0x179   : > { %931 = vrot.lane.b32.xlu2 %v870_v54, %s1967_s20  ;;  %v775_v27 = vsel %vm774_vm15, %v1889_v26, %v771_v51  ;;  %vm849_vm3 = vmor %vm847_vm1, %vm848_vm13  ;;  %v875_v21 = vmul.f32 %v2334_v1, %v874_v15  ;;  %v854_v24 = vor.u32 1.1754944e-38, %v853_v37  ;;  %vm878_vm5 = vweird.f32 %v2334_v1 }
 0x17a   : > { %v780_v52 = vsel %vm777_vm2, %v779_v57, %v775_v27  ;;  %v850_v63 = vsel %vm849_vm3, %v1891_v7, %v846_v34  ;;  %vm852_vm4 = vcmp.eq.f32.partialorder %v851_v56, 8.507059e+37  ;;  %v883_v30 = vand.u32 2147483648, %v2272_v32 }
 0x17b   : > { %919 = vrot.lane.b32.xlu1 %v780_v52, %s1967_s20  ;;  %v855_v3 = vsel %vm852_vm4, %v854_v24, %v850_v63  ;;  %v876_v18 = vadd.f32 %v2334_v1, %v875_v21  ;;  %vm877_vm6 = vweird.f32 %v2272_v32  ;;  %v881_v31 = vand.u32 2147483647, %v2272_v32 }
 0x17c   : > { %vm879_vm7 = vmor %vm877_vm6, %vm878_vm5  ;;  %v884_v15 = vor.u32 1.1754944e-38, %v883_v30  ;;  %vm969_vm9 = vcmask 130048  }
 0x17d   : > { %v880_v59 = vsel %vm879_vm7, %v2334_v1, %v876_v18  ;;  %vm882_vm8 = vcmp.eq.f32.partialorder %v881_v31, 8.507059e+37 }
 0x17e   : > { %929 = vrot.lane.b32.xlu0 %v855_v3, %s1967_s20  ;;  %v885_v6 = vsel %vm882_vm8, %v884_v15, %v880_v59 }
 0x186   : > { %933 = vrot.lane.b32.xlu0 %v885_v6, %s1967_s20 }
 0x1ae   : > { %v922_v17 = vpop.permute.xlu2 %921 }
 0x1af   : > { %v2544_v49 = vmul.f32 %v922_v17, %v2217_v25 }
 0x1b1   : > { %3216 = vst [vmem:[#allocation2_spill] sm:$0xff] %v2544_v49  ;;  %1781 = vmatmul.msk.f32.vlgmr.msra.gmra.mxu3 %vm969_vm9, %v2544_v49 }
 0x1b6   : > { %v912_v7 = vpop.permute.xlu2 %911 }
 0x1b7   : > { %v2577_v62 = vmul.f32 %v912_v7, %v2226_v19 }
 0x1c7   : > { %v908_v26 = vpop.permute.xlu1 %907 }
 0x1c8   : > { %v2559_v8 = vmul.f32 %v908_v26, %v2220_v61  ;;  %v926_v61 = vpop.permute.xlu2 %925 }
 0x1c9   : > { %v2574_v11 = vmul.f32 %v926_v61, %v2247_v5 }
 0x1ca   : > { %v904_v32 = vpop.permute.xlu0 %903 }
 0x1cb   : > { %v2549_v1 = vmul.f32 %v904_v32, %v2223_v50  ;;  %3217 = vst [vmem:[#allocation3_spill] sm:$0xff] %v2574_v11 }
 0x1cd   : > { %1772 = vmatmul.msk.f32.vlgmr.msra.gmra.mxu1 %vm969_vm9, %v2549_v1 }
 0x1cf   : > { %v910_v25 = vpop.permute.xlu1 %909 }
 0x1d0   : > { %v2567_v13 = vmul.f32 %v910_v25, %v2237_v29  ;;  %v918_v5 = vpop.permute.xlu2 %917 }
 0x1d1   : > { %v2607_v2 = vmul.f32 %v918_v5, %v2285_v35 }
 0x1d2   : > { %v906_v41 = vpop.permute.xlu0 %905 }
 0x1d3   : > { %v2554_v9 = vmul.f32 %v906_v41, %v2241_v4 }
 0x1d5   : > { %1773 = vmatmul.msk.f32.gmra.mxu1 %vm969_vm9, %v2554_v9 }
 0x1d7   : > { %v914_v4 = vpop.permute.xlu1 %913 }
 0x1d8   : > { %v2587_v53 = vmul.f32 %v914_v4, %v2251_v38  ;;  %v932_v38 = vpop.permute.xlu2 %931 }
 0x1dd   : > { %1774 = vmatmul.msk.f32.gmra.mxu1 %vm969_vm9, %v2559_v8  ;;  %v924_v50 = vpop.permute.xlu0 %923 }
 0x1de   : > { %v2564_v12 = vmul.f32 %v924_v50, %v2278_v39 }
 0x1e0   : > { %1782 = vmatmul.msk.f32.gmra.mxu3 %vm969_vm9, %v2564_v12 }
 0x1e5   : > { %1775 = vmatmul.msk.f32.gmra.mxu1 %vm969_vm9, %v2567_v13  ;;  %v928_v29 = vpop.permute.xlu1 %927 }
 0x1e6   : > { %v2584_v46 = vmul.f32 %v928_v29, %v2270_v16  ;;  %v2604_v16 = vmul.f32 %v932_v38, %v2297_v28 }
 0x1e8   : > { %1783 = vmatmul.msk.f32.gmra.mxu3 %vm969_vm9, %v2574_v11  ;;  %v916_v39 = vpop.permute.xlu0 %915  ;;  %3218 = vst [vmem:[#allocation4_spill] sm:$0xff] %v2584_v46 }
 0x1e9   : > { %v2597_v36 = vmul.f32 %v916_v39, %v2288_v20  ;;  %3220 = vst [vmem:[#allocation6_spill] sm:$0xff] %v2604_v16 }
 0x1eb   : > { %3219 = vst [vmem:[#allocation5_spill] sm:$0xff] %v2597_v36 }
 0x1ed   : > { %1776 = vmatmul.msk.f32.gmra.mxu1 %vm969_vm9, %v2577_v62  ;;  %v920_v20 = vpop.permute.xlu1 %919 }
 0x1ee   : > { %v2617_v44 = vmul.f32 %v920_v20, %v2322_v55 }
 0x1f0   : > { %1784 = vmatmul.msk.f32.gmra.mxu3 %vm969_vm9, %v2584_v46  ;;  %v930_v19 = vpop.permute.xlu0 %929 }
 0x1f1   : > { %v2594_v42 = vmul.f32 %v930_v19, %v2281_v33 }
 0x1f5   : > { %1777 = vmatmul.msk.f32.gmra.mxu1 %vm969_vm9, %v2587_v53 }
 0x1f8   : > { %1785 = vmatmul.msk.f32.gmra.mxu3 %vm969_vm9, %v2594_v42  ;;  %v934_v33 = vpop.permute.xlu0 %933 }
 0x1f9   : > { %v2614_v22 = vmul.f32 %v934_v33, %v2214_v60 }
 0x1fb   : > { %3221 = vst [vmem:[#allocation7_spill] sm:$0xff] %v2614_v22 }
 0x1fd   : > { %1778 = vmatmul.msk.f32.gmra.mxu1 %vm969_vm9, %v2597_v36 }
 0x200   : > { %1786 = vmatmul.msk.f32.gmra.mxu3 %vm969_vm9, %v2604_v16 }
 0x205   : > { %1779 = vmatmul.msk.f32.gmra.mxu1 %vm969_vm9, %v2607_v2 }
 0x208   : > { %1787 = vmatmul.msk.f32.gmra.mxu3 %vm969_vm9, %v2614_v22 }
 0x20d   : > { %1780 = vmatmul.msk.f32.gmra.mxu1 %vm969_vm9, %v2617_v44 }
 0x234   : > { %v2623_v48 = vpop.f32.mrf.mxu3 }
 0x235   : > { %v1100_v32 = vsel %vm302_vm0, %v2623_v48, 0.0 }
 0x24a   : > { %v1035_v35 = vpop.f32.mrf.mxu1 }
 0x24b   : > { %v1083_v54 = vsel %vm302_vm0, %v1035_v35, 0.0 }
 0x252   : > { %v1038_v28 = vpop.f32.mrf.mxu1 }
 0x253   : > { %v1084_v43 = vsel %vm302_vm0, %v1038_v28, 0.0 }
 0x254   : > { %v1085_v37 = vadd.f32 %v1084_v43, %v1083_v54 }
 0x25a   : > { %v1041_v45 = vpop.f32.mrf.mxu1 }
 0x25b   : > { %v1086_v51 = vsel %vm302_vm0, %v1041_v45, 0.0 }
 0x25c   : > { %v1087_v34 = vadd.f32 %v1086_v51, %v1085_v37 }
 0x262   : > { %v1044_v23 = vpop.f32.mrf.mxu1 }
 0x263   : > { %v2625_v58 = vpop.f32.mrf.mxu3  ;;  %v1088_v57 = vsel %vm302_vm0, %v1044_v23, 0.0 }
 0x264   : > { %v1089_v27 = vadd.f32 %v1088_v57, %v1087_v34  ;;  %v1102_v41 = vsel %vm302_vm0, %v2625_v58, 0.0 }
 0x26a   : > { %v1047_v0 = vpop.f32.mrf.mxu1 }
 0x26b   : > { %v2627_v60 = vpop.f32.mrf.mxu3  ;;  %v1090_v56 = vsel %vm302_vm0, %v1047_v0, 0.0 }
 0x26c   : > { %v1091_v24 = vadd.f32 %v1090_v56, %v1089_v27  ;;  %v1104_v7 = vsel %vm302_vm0, %v2627_v60, 0.0 }
 0x272   : > { %v1050_v47 = vpop.f32.mrf.mxu1 }
 0x273   : > { %v2629_v55 = vpop.f32.mrf.mxu3  ;;  %v1092_v21 = vsel %vm302_vm0, %v1050_v47, 0.0 }
 0x274   : > { %v1093_v18 = vadd.f32 %v1092_v21, %v1091_v24  ;;  %v1106_v4 = vsel %vm302_vm0, %v2629_v55, 0.0 }
 0x27a   : > { %v1053_v10 = vpop.f32.mrf.mxu1 }
 0x27b   : > { %v2636_v52 = vpop.f32.mrf.mxu3  ;;  %v1094_v3 = vsel %vm302_vm0, %v1053_v10, 0.0 }
 0x27c   : > { %v1095_v31 = vadd.f32 %v1094_v3, %v1093_v18  ;;  %v1108_v39 = vsel %vm302_vm0, %v2636_v52, 0.0 }
 0x282   : > { %v1056_v63 = vpop.f32.mrf.mxu1 }
 0x283   : > { %v1096_v30 = vsel %vm302_vm0, %v1056_v63, 0.0  ;;  %v2642_v40 = vpop.f32.mrf.mxu3 }
 0x284   : > { %v1097_v59 = vadd.f32 %v1096_v30, %v1095_v31  ;;  %v1110_v19 = vsel %vm302_vm0, %v2642_v40, 0.0 }
 0x28a   : > { %v1059_v15 = vpop.f32.mrf.mxu1 }
 0x28b   : > { %v1098_v6 = vsel %vm302_vm0, %v1059_v15, 0.0  ;;  %v1080_v29 = vpop.f32.mrf.mxu3 }
 0x28c   : > { %v1099_v17 = vadd.f32 %v1098_v6, %v1097_v59  ;;  %v1112_v33 = vsel %vm302_vm0, %v1080_v29, 0.0 }
 0x28e   : > { %v1101_v26 = vadd.f32 %v1100_v32, %v1099_v17 }
 0x290   : > { %v1103_v25 = vadd.f32 %v1102_v41, %v1101_v26 }
 0x292   : > { %v1105_v50 = vadd.f32 %v1104_v7, %v1103_v25 }
 0x294   : > { %v1107_v61 = vadd.f32 %v1106_v4, %v1105_v50 }
 0x296   : > { %v1109_v5 = vadd.f32 %v1108_v39, %v1107_v61 }
 0x298   : > { %v1111_v38 = vadd.f32 %v1110_v19, %v1109_v5 }
 0x29a   : > { %v1113_v20 = vadd.f32 %v1112_v33, %v1111_v38 }
 0x29c   : > { %v1114_v43 = vrot.slane %v1113_v20, 4 }
 0x29e   : > { %v1115_v54 = vadd.f32 %v1114_v43, %v1113_v20 }
 0x2a0   : > { %v1116_v51 = vrot.slane %v1115_v54, 2 }
 0x2a2   : > { %v1117_v37 = vadd.f32 %v1116_v51, %v1115_v54 }
 0x2a4   : > { %v1118_v57 = vrot.slane %v1117_v37, 1 }
 0x2a6   : > { %v1119_v34 = vadd.f32 %v1118_v57, %v1117_v37 }
 0x2a8   : > { %v1120_v56 = vmul.f32 %v1119_v34, %v2113_v14 }
 0x2aa   : > { %v2658_v27 = vsub.f32 %v1035_v35, %v1120_v56  ;;  %v2660_v21 = vsub.f32 %v1038_v28, %v1120_v56  ;;  %v2662_v24 = vsub.f32 %v1041_v45, %v1120_v56  ;;  %v2664_v3 = vsub.f32 %v1044_v23, %v1120_v56 }
 0x2ab   : > { %v2670_v31 = vsub.f32 %v1047_v0, %v1120_v56  ;;  %v2674_v6 = vsub.f32 %v1050_v47, %v1120_v56  ;;  %v2680_v17 = vsub.f32 %v1053_v10, %v1120_v56  ;;  %v2685_v41 = vsub.f32 %v1056_v63, %v1120_v56 }
 0x2ac   : > { %v1137_v18 = vmul.f32 %v2658_v27, %v2658_v27  ;;  %v1138_v30 = vmul.f32 %v2660_v21, %v2660_v21  ;;  %v1139_v59 = vmul.f32 %v2662_v24, %v2662_v24  ;;  %v1140_v35 = vmul.f32 %v2664_v3, %v2664_v3 }
 0x2ad   : > { %v1141_v32 = vmul.f32 %v2670_v31, %v2670_v31  ;;  %v1142_v47 = vmul.f32 %v2674_v6, %v2674_v6  ;;  %v2690_v50 = vsub.f32 %v1059_v15, %v1120_v56  ;;  %v1143_v10 = vmul.f32 %v2680_v17, %v2680_v17 }
 0x2ae   : > { %v1153_v28 = vsel %vm302_vm0, %v1137_v18, 0.0  ;;  %v1154_v45 = vsel %vm302_vm0, %v1138_v30, 0.0  ;;  %v1156_v0 = vsel %vm302_vm0, %v1139_v59, 0.0  ;;  %v1158_v25 = vsel %vm302_vm0, %v1140_v35, 0.0 }
 0x2af   : > { %v1155_v23 = vadd.f32 %v1154_v45, %v1153_v28  ;;  %v1160_v4 = vsel %vm302_vm0, %v1141_v32, 0.0  ;;  %v2696_v39 = vsub.f32 %v2623_v48, %v1120_v56  ;;  %v1144_v63 = vmul.f32 %v2685_v41, %v2685_v41 }
 0x2b0   : > { %v1162_v5 = vsel %vm302_vm0, %v1142_v47, 0.0  ;;  %v2702_v38 = vsub.f32 %v2625_v58, %v1120_v56  ;;  %v1145_v15 = vmul.f32 %v2690_v50, %v2690_v50  ;;  %v1164_v33 = vsel %vm302_vm0, %v1143_v10, 0.0 }
 0x2b1   : > { %v1157_v26 = vadd.f32 %v1156_v0, %v1155_v23  ;;  %v2708_v43 = vsub.f32 %v2627_v60, %v1120_v56  ;;  %v1146_v48 = vmul.f32 %v2696_v39, %v2696_v39  ;;  %v1166_v54 = vsel %vm302_vm0, %v1144_v63, 0.0 }
 0x2b2   : > { %v2714_v37 = vsub.f32 %v2629_v55, %v1120_v56  ;;  %v1147_v58 = vmul.f32 %v2702_v38, %v2702_v38  ;;  %v1168_v57 = vsel %vm302_vm0, %v1145_v15, 0.0  ;;  %v2720_v18 = vsub.f32 %v2636_v52, %v1120_v56 }
 0x2b3   : > { %v1159_v7 = vadd.f32 %v1158_v25, %v1157_v26  ;;  %v1148_v60 = vmul.f32 %v2708_v43, %v2708_v43  ;;  %v1170_v30 = vsel %vm302_vm0, %v1146_v48, 0.0  ;;  %v2726_v35 = vsub.f32 %v2642_v40, %v1120_v56 }
 0x2b4   : > { %v1149_v55 = vmul.f32 %v2714_v37, %v2714_v37  ;;  %v1172_v28 = vsel %vm302_vm0, %v1147_v58, 0.0  ;;  %v2731_v23 = vsub.f32 %v1080_v29, %v1120_v56  ;;  %v1150_v52 = vmul.f32 %v2720_v18, %v2720_v18 }
 0x2b5   : > { %v1161_v61 = vadd.f32 %v1160_v4, %v1159_v7  ;;  %v1174_v32 = vsel %vm302_vm0, %v1148_v60, 0.0  ;;  %v1151_v26 = vmul.f32 %v2726_v35, %v2726_v35 }
 0x2b6   : > { %v1176_v40 = vsel %vm302_vm0, %v1149_v55, 0.0  ;;  %v1152_v25 = vmul.f32 %v2731_v23, %v2731_v23  ;;  %v1178_v7 = vsel %vm302_vm0, %v1150_v52, 0.0 }
 0x2b7   : > { %v1163_v19 = vadd.f32 %v1162_v5, %v1161_v61  ;;  %v1180_v29 = vsel %vm302_vm0, %v1151_v26, 0.0 }
 0x2b8   : > { %v1182_v4 = vsel %vm302_vm0, %v1152_v25, 0.0 }
 0x2b9   : > { %v1165_v20 = vadd.f32 %v1164_v33, %v1163_v19 }
 0x2bb   : > { %v1167_v51 = vadd.f32 %v1166_v54, %v1165_v20 }
 0x2bd   : > { %v1169_v34 = vadd.f32 %v1168_v57, %v1167_v51 }
 0x2bf   : > { %v1171_v59 = vadd.f32 %v1170_v30, %v1169_v34  ;;  %v1191_v30 = vld [vmem:[%s3186_s5] sm:$0x1] }
 0x2c1   : > { %v1173_v45 = vadd.f32 %v1172_v28, %v1171_v59 }
 0x2c3   : > { %v1175_v0 = vadd.f32 %v1174_v32, %v1173_v45 }
 0x2c5   : > { %v1177_v47 = vadd.f32 %v1176_v40, %v1175_v0 }
 0x2c7   : > { %v1179_v10 = vadd.f32 %v1178_v7, %v1177_v47 }
 0x2c9   : > { %v1181_v56 = vadd.f32 %v1180_v29, %v1179_v10 }
 0x2cb   : > { %v1183_v61 = vadd.f32 %v1182_v4, %v1181_v56 }
 0x2cd   : > { %v1184_v63 = vrot.slane %v1183_v61, 4 }
 0x2cf   : > { %v1185_v5 = vadd.f32 %v1184_v63, %v1183_v61 }
 0x2d1   : > { %v1186_v19 = vrot.slane %v1185_v5, 2 }
 0x2d3   : > { %v1187_v15 = vadd.f32 %v1186_v19, %v1185_v5 }
 0x2d5   : > { %v1188_v33 = vrot.slane %v1187_v15, 1 }
 0x2d7   : > { %v1189_v20 = vadd.f32 %v1188_v33, %v1187_v15 }
 0x2d9   : > { %v1190_v48 = vmul.f32 %v1189_v20, %v2113_v14  ;;  %v2753_v14 = vld [vmem:[%s3187_s6] ss:$0 sm:$0xff] }
 0x2db   : > { %v1192_v54 = vadd.f32 1e-05, %v1190_v48 }
 0x2dd   : > { %1892 = vrsqrt.f32 %v1192_v54  ;;  %vm1199_vm0 = vweird.f32 %v1192_v54 }
 0x2e3   : > { %v1893_v51 = vpop.eup %1892 }
 0x2e4   : > { %v1194_v58 = vmul.f32 %v1893_v51, %v1192_v54  ;;  %vm1200_vm10 = vweird.f32 %v1893_v51 }
 0x2e5   : > { %vm1201_vm11 = vmor %vm1199_vm0, %vm1200_vm10 }
 0x2e6   : > { %v1195_v57 = vmul.f32 %v1893_v51, %v1194_v58 }
 0x2e8   : > { %v1196_v34 = vmul.f32 0.5, %v1195_v57 }
 0x2ea   : > { %v1197_v60 = vsub.f32 1.5, %v1196_v34 }
 0x2ec   : > { %v1198_v59 = vmul.f32 %v1893_v51, %v1197_v60 }
 0x2ee   : > { %v1202_v55 = vsel %vm1201_vm11, %v1893_v51, %v1198_v59 }
 0x2ef   : > { %v1203_v28 = vmul.f32 %v1202_v55, %v1191_v30 }
 0x2f1   : > { %v2748_v45 = vperm.slane %v1203_v28, 0 }
 0x2f3   : > { %v1212_v52 = vmul.f32 %v2748_v45, %v2674_v6  ;;  %v1215_v32 = vmul.f32 %v2748_v45, %v2690_v50  ;;  %v1209_v26 = vmul.f32 %v2748_v45, %v2662_v24  ;;  %v1208_v40 = vmul.f32 %v2748_v45, %v2660_v21 }
 0x2f4   : > { %v1207_v6 = vmul.f32 %v2748_v45, %v2658_v27  ;;  %v1211_v21 = vmul.f32 %v2748_v45, %v2670_v31  ;;  %v1210_v56 = vmul.f32 %v2748_v45, %v2664_v3  ;;  %v1214_v31 = vmul.f32 %v2748_v45, %v2685_v41 }
 0x2f5   : > { %v2760_v0 = vadd.f32 %v2753_v14, %v1215_v32  ;;  %v2767_v47 = vadd.f32 %v2753_v14, %v1212_v52  ;;  %v2773_v7 = vadd.f32 %v2753_v14, %v1209_v26  ;;  %v2776_v50 = vadd.f32 %v2753_v14, %v1208_v40 }
 0x2f6   : > { %v2779_v10 = vadd.f32 %v2753_v14, %v1207_v6  ;;  %v2790_v61 = vadd.f32 %v2753_v14, %v1211_v21  ;;  %v1216_v63 = vmul.f32 %v2748_v45, %v2696_v39  ;;  %v2797_v3 = vadd.f32 %v2753_v14, %v1210_v56 }
 0x2f7   : > { %v1796_v25 = vmul.f32 -1.442695, %v2760_v0  ;;  %v1790_v24 = vmul.f32 -1.442695, %v2773_v7  ;;  %v1789_v29 = vmul.f32 -1.442695, %v2776_v50  ;;  %v1213_v15 = vmul.f32 %v2748_v45, %v2680_v17 }
 0x2f8   : > { %v1788_v27 = vmul.f32 -1.442695, %v2779_v10  ;;  %v1793_v4 = vmul.f32 -1.442695, %v2767_v47  ;;  %v1792_v5 = vmul.f32 -1.442695, %v2790_v61  ;;  %v1217_v48 = vmul.f32 %v2748_v45, %v2702_v38 }
 0x2f9   : > { %1894 = vpow2.f32 %v1796_v25  ;;  %v1791_v33 = vmul.f32 -1.442695, %v2797_v3  ;;  %v1218_v41 = vmul.f32 %v2748_v45, %v2708_v43  ;;  %v2808_v54 = vadd.f32 %v2753_v14, %v1214_v31 }
 0x2fa   : > { %1896 = vpow2.f32 %v1790_v24  ;;  %v2811_v51 = vadd.f32 %v2753_v14, %v1216_v63  ;;  %v1221_v38 = vmul.f32 %v2748_v45, %v2726_v35  ;;  %v1220_v60 = vmul.f32 %v2748_v45, %v2720_v18 }
 0x2fb   : > { %1898 = vpow2.f32 %v1789_v29  ;;  %v2824_v30 = vadd.f32 %v2753_v14, %v1213_v15  ;;  %v2829_v59 = vmul.f32 %v2748_v45, %v2714_v37  ;;  %v2832_v55 = vadd.f32 %v2753_v14, %v1218_v41 }
 0x2fc   : > { %1900 = vpow2.f32 %v1788_v27  ;;  %3222 = vst [vmem:[#allocation8_spill] sm:$0xff] %v2811_v51  ;;  %v2836_v35 = vadd.f32 %v2753_v14, %v1217_v48  ;;  %v1795_v28 = vmul.f32 -1.442695, %v2808_v54  ;;  %v2844_v32 = vmul.f32 -1.442695, %v2811_v51 }
 0x2fd   : > { %1902 = vpow2.f32 %v1793_v4  ;;  %3223 = vst [vmem:[#allocation9_spill] sm:$0xff] %v2824_v30  ;;  %v2849_v26 = vadd.f32 %v2753_v14, %v1221_v38  ;;  %v2854_v6 = vmul.f32 -1.442695, %v2824_v30  ;;  %v2857_v21 = vadd.f32 %v2753_v14, %v1220_v60 }
 0x2fe   : > { %1904 = vpow2.f32 %v1792_v5  ;;  %3224 = vst [vmem:[#allocation10_spill] sm:$0xff] %v2832_v55  ;;  %v2863_v27 = vmul.f32 -1.442695, %v2832_v55 }
 0x2ff   : > { %v1895_v19 = vpop.eup %1894  ;;  %1906 = vpow2.f32 %v1791_v33 }
 0x300   : > { %v1897_v20 = vpop.eup %1896  ;;  %v2815_v57 = vadd.f32 1.0, %v1895_v19 }
 0x301   : > { %v1899_v39 = vpop.eup %1898  ;;  %v2813_v58 = vadd.f32 1.0, %v1897_v20 }
 0x302   : > { %v1901_v17 = vpop.eup %1900  ;;  %v2817_v34 = vadd.f32 1.0, %v1899_v39 }
 0x303   : > { %v1903_v43 = vpop.eup %1902  ;;  %1908 = vrcp.f32 %v2813_v58  ;;  %v2839_v18 = vadd.f32 1.0, %v1901_v17  ;;  %v1346_v37 = vand.u32 2147483647, %v2813_v58  ;;  %v1348_v25 = vand.u32 2147483648, %v2813_v58 }
 0x304   : > { %1910 = vrcp.f32 %v2817_v34  ;;  %v2841_v52 = vadd.f32 1.0, %v1903_v43  ;;  %v1905_v40 = vpop.eup %1904  ;;  %v1331_v29 = vand.u32 2147483647, %v2817_v34  ;;  %v1333_v56 = vand.u32 2147483648, %v2817_v34 }
 0x305   : > { %1912 = vrcp.f32 %v2815_v57  ;;  %v1907_v24 = vpop.eup %1906  ;;  %vm1342_vm12 = vweird.f32 %v2813_v58  ;;  %vm1327_vm13 = vweird.f32 %v2817_v34  ;;  %v2867_v31 = vadd.f32 1.0, %v1905_v40 }
 0x306   : > { %1914 = vrcp.f32 %v2839_v18  ;;  %v2869_v63 = vadd.f32 1.0, %v1907_v24  ;;  %vm2872_vm14 = vcmp.eq.f32.partialorder %v1346_v37, 8.507059e+37  ;;  %v1316_v33 = vand.u32 2147483647, %v2839_v18 }
 0x307   : > { %1916 = vrcp.f32 %v2841_v52  ;;  %v1318_v20 = vand.u32 2147483648, %v2839_v18  ;;  %v1349_v48 = vor.u32 1.1754944e-38, %v1348_v25  ;;  %v1393_v39 = vand.u32 2147483648, %v2841_v52 }
 0x308   : > { %1918 = vpow2.f32 %v1795_v28  ;;  %vm2883_vm15 = vcmp.eq.f32.partialorder %v1331_v29, 8.507059e+37  ;;  %v1334_v60 = vor.u32 1.1754944e-38, %v1333_v56  ;;  %vm1312_vm1 = vweird.f32 %v2839_v18 }
 0x309   : > { %v1909_v4 = vpop.eup %1908  ;;  %1920 = vrcp.f32 %v2867_v31  ;;  %v1391_v28 = vand.u32 2147483647, %v2841_v52  ;;  %v2891_v25 = vmul.f32 -1.442695, %v2836_v35  ;;  %vm2896_vm3 = vcmp.eq.f32.partialorder %v1316_v33, 8.507059e+37 }
 0x30a   : > { %v1911_v5 = vpop.eup %1910  ;;  %v1338_v19 = vmul.f32 %v1909_v4, %v2813_v58  ;;  %1922 = vrcp.f32 %v2869_v63  ;;  %vm1343_vm2 = vweird.f32 %v1909_v4  ;;  %v1319_v56 = vor.u32 1.1754944e-38, %v1318_v20 }
 0x30b   : > { %v1323_v41 = vmul.f32 %v1911_v5, %v2817_v34  ;;  %v2881_v17 = vpop.eup %1912  ;;  %vm1387_vm4 = vweird.f32 %v2841_v52  ;;  %vm1328_vm5 = vweird.f32 %v1911_v5  ;;  %v1394_v16 = vor.u32 1.1754944e-38, %v1393_v39  ;;  %vm1344_vm7 = vmor %vm1342_vm12, %vm1343_vm2 }
 0x30c   : > { %v1339_v38 = vsub.f32 1.0, %v1338_v19  ;;  %v1915_v37 = vpop.eup %1914  ;;  %vm1372_vm6 = vweird.f32 %v2867_v31  ;;  %v1428_v36 = vmul.f32 %v2881_v17, %v2815_v57  ;;  %vm1329_vm8 = vmor %vm1327_vm13, %vm1328_vm5  ;;  %vm2916_vm0 = vcmp.eq.f32.partialorder %v1391_v28, 8.507059e+37 }
 0x30d   : > { %v1324_v40 = vsub.f32 1.0, %v1323_v41  ;;  %v2893_v24 = vpop.eup %1916  ;;  %v1308_v29 = vmul.f32 %v1915_v37, %v2839_v18  ;;  %vm1313_vm10 = vweird.f32 %v1915_v37  ;;  %vm1357_vm11 = vweird.f32 %v2869_v63 }
 0x30e   : > { %v1340_v22 = vmul.f32 %v1909_v4, %v1339_v38  ;;  %v1383_v46 = vmul.f32 %v2893_v24, %v2841_v52  ;;  %v1919_v49 = vpop.eup %1918  ;;  %v1376_v38 = vand.u32 2147483647, %v2867_v31  ;;  %vm1388_vm12 = vweird.f32 %v2893_v24  ;;  %vm1314_vm13 = vmor %vm1312_vm1, %vm1313_vm10 }
 0x30f   : > { %v1325_v41 = vmul.f32 %v1911_v5, %v1324_v40  ;;  %v1309_v11 = vsub.f32 1.0, %v1308_v29  ;;  %v1921_v33 = vpop.eup %1920  ;;  %v1378_v40 = vand.u32 2147483648, %v2867_v31  ;;  %v1429_v15 = vsub.f32 1.0, %v1428_v36 }
 0x310   : > { %v1341_v51 = vadd.f32 %v1909_v4, %v1340_v22  ;;  %v1384_v55 = vsub.f32 1.0, %v1383_v46  ;;  %v2911_v39 = vpop.eup %1922  ;;  %v1368_v46 = vmul.f32 %v1921_v33, %v2867_v31  ;;  %1924 = vpow2.f32 %v2854_v6 }
 0x311   : > { %v1326_v20 = vadd.f32 %v1911_v5, %v1325_v41  ;;  %v1310_v29 = vmul.f32 %v1915_v37, %v1309_v11  ;;  %v1353_v34 = vmul.f32 %v2911_v39, %v2869_v63  ;;  %v1361_v36 = vand.u32 2147483647, %v2869_v63 }
 0x312   : > { %v1345_v22 = vsel %vm1344_vm7, %v1909_v4, %v1341_v51  ;;  %v1385_v51 = vmul.f32 %v2893_v24, %v1384_v55  ;;  %v1369_v28 = vsub.f32 1.0, %v1368_v46  ;;  %vm1358_vm1 = vweird.f32 %v2911_v39 }
 0x313   : > { %v1350_v58 = vsel %vm2872_vm14, %v1349_v48, %v1345_v22  ;;  %v1330_v41 = vsel %vm1329_vm8, %v1911_v5, %v1326_v20  ;;  %v1311_v4 = vadd.f32 %v1915_v37, %v1310_v29  ;;  %v1354_v55 = vsub.f32 1.0, %v1353_v34  ;;  %vm2973_vm5 = vmor %vm1357_vm11, %vm1358_vm1 }
 0x314   : > { %1567 = vrot.lane.b32.xlu0 %v1350_v58, %s1967_s20  ;;  %v1335_v11 = vsel %vm2883_vm15, %v1334_v60, %v1330_v41  ;;  %v1386_v5 = vadd.f32 %v2893_v24, %v1385_v51  ;;  %v2935_v48 = vadd.f32 1.0, %v1919_v49  ;;  %v1370_v22 = vmul.f32 %v1921_v33, %v1369_v28  ;;  %vm2942_vm15 = vmor %vm1387_vm4, %vm1388_vm12 }
 0x315   : > { %1565 = vrot.lane.b32.xlu2 %v1335_v11, %s1967_s20  ;;  %v1315_v20 = vsel %vm1314_vm13, %v1915_v37, %v1311_v4  ;;  %vm1373_vm14 = vweird.f32 %v1921_v33  ;;  %v1355_v18 = vmul.f32 %v2911_v39, %v1354_v55  ;;  %v1430_v49 = vmul.f32 %v2881_v17, %v1429_v15 }
 0x316   : > { %v1320_v43 = vsel %vm2896_vm3, %v1319_v56, %v1315_v20  ;;  %v1390_v6 = vsel %vm2942_vm15, %v2893_v24, %v1386_v5  ;;  %v1371_v37 = vadd.f32 %v1921_v33, %v1370_v22  ;;  %1926 = vrcp.f32 %v2935_v48  ;;  %vm2957_vm2 = vmor %vm1372_vm6, %vm1373_vm14  ;;  %v1925_v41 = vpop.eup %1924 }
 0x317   : > { %1563 = vrot.lane.b32.xlu1 %v1320_v43, %s1967_s20  ;;  %v1379_v19 = vor.u32 1.1754944e-38, %v1378_v40  ;;  %v1356_v56 = vadd.f32 %v2911_v39, %v1355_v18  ;;  %v1363_v29 = vand.u32 2147483648, %v2869_v63  ;;  %vm1433_vm3 = vweird.f32 %v2881_v17 }
 0x318   : > { %v1375_v24 = vsel %vm2957_vm2, %v1921_v33, %v1371_v37  ;;  %v1431_v46 = vadd.f32 %v2881_v17, %v1430_v49  ;;  %1928 = vpow2.f32 %v2863_v27  ;;  %v1802_v31 = vmul.f32 -1.442695, %v2849_v26 }
 0x319   : > { %v1395_v58 = vsel %vm2916_vm0, %v1394_v16, %v1390_v6  ;;  %vm1377_vm4 = vcmp.eq.f32.partialorder %v1376_v38, 8.507059e+37  ;;  %vm1432_vm6 = vweird.f32 %v2815_v57  ;;  %v1436_v33 = vand.u32 2147483647, %v2815_v57 }
 0x31a   : > { %v1380_v27 = vsel %vm1377_vm4, %v1379_v19, %v1375_v24  ;;  %v1360_v30 = vsel %vm2973_vm5, %v2911_v39, %v1356_v56  ;;  %v1438_v16 = vand.u32 2147483648, %v2815_v57  ;;  %1930 = vpow2.f32 %v2891_v25  ;;  %vm2988_vm7 = vmor %vm1432_vm6, %vm1433_vm3 }
 0x31b   : > { %v1364_v63 = vor.u32 1.1754944e-38, %v1363_v29  ;;  %v2992_v51 = vadd.f32 1.0, %v1925_v41  ;;  %1932 = vpow2.f32 %v2844_v32  ;;  %v2997_v39 = vadd.f32 %v2753_v14, %v2829_v59 }
 0x31c   : > { %1573 = vrot.lane.b32.xlu0 %v1395_v58, %s1967_s20  ;;  %v1927_v57 = vpop.eup %1926  ;;  %vm1362_vm8 = vcmp.eq.f32.partialorder %v1361_v36, 8.507059e+37  ;;  %v1435_v25 = vsel %vm2988_vm7, %v2881_v17, %v1431_v46  ;;  %1934 = vpow2.f32 %v1802_v31  ;;  %v1801_v34 = vmul.f32 -1.442695, %v2857_v21 }
 0x31d   : > { %1571 = vrot.lane.b32.xlu2 %v1380_v27, %s1967_s20  ;;  %v1365_v11 = vsel %vm1362_vm8, %v1364_v63, %v1360_v30  ;;  %v1413_v4 = vmul.f32 %v1927_v57, %v2935_v48  ;;  %1936 = vrcp.f32 %v2992_v51  ;;  %v1222_v32 = vmul.f32 %v2748_v45, %v2731_v23 }
 0x31e   : > { %v1929_v28 = vpop.eup %1928  ;;  %v1439_v59 = vor.u32 1.1754944e-38, %v1438_v16  ;;  %vm1437_vm10 = vcmp.eq.f32.partialorder %v1436_v33, 8.507059e+37  ;;  %v1800_v17 = vmul.f32 -1.442695, %v2997_v39  ;;  %v1421_v22 = vand.u32 2147483647, %v2935_v48 }
 0x31f   : > { %1569 = vrot.lane.b32.xlu1 %v1365_v11, %s1967_s20  ;;  %v1414_v5 = vsub.f32 1.0, %v1413_v4  ;;  %v3008_v55 = vadd.f32 1.0, %v1929_v28  ;;  %v1423_v43 = vand.u32 2147483648, %v2935_v48  ;;  %1938 = vpow2.f32 %v1801_v34 }
 0x320   : > { %v1931_v15 = vpop.eup %1930  ;;  %v1440_v20 = vsel %vm1437_vm10, %v1439_v59, %v1435_v25  ;;  %vm1418_vm0 = vweird.f32 %v1927_v57  ;;  %v3015_v23 = vadd.f32 %v2753_v14, %v1222_v32  ;;  %vm1417_vm11 = vweird.f32 %v2935_v48 }
 0x321   : > { %v1933_v60 = vpop.eup %1932  ;;  %v1415_v18 = vmul.f32 %v1927_v57, %v1414_v5  ;;  %1940 = vrcp.f32 %v3008_v55  ;;  %v3019_v36 = vadd.f32 1.0, %v1931_v15  ;;  %v1406_v52 = vand.u32 2147483647, %v2992_v51  ;;  %vm1419_vm12 = vmor %vm1417_vm11, %vm1418_vm0 }
 0x322   : > { %v1935_v45 = vpop.eup %1934  ;;  %v3021_v49 = vadd.f32 1.0, %v1933_v60  ;;  %v1408_v19 = vand.u32 2147483648, %v2992_v51  ;;  %1942 = vpow2.f32 %v1800_v17  ;;  %v1424_v56 = vor.u32 1.1754944e-38, %v1423_v43 }
 0x323   : > { %v1937_v6 = vpop.eup %1936  ;;  %v1416_v37 = vadd.f32 %v1927_v57, %v1415_v18  ;;  %1944 = vrcp.f32 %v3019_v36  ;;  %v3027_v29 = vadd.f32 1.0, %v1935_v45  ;;  %vm1422_vm13 = vcmp.eq.f32.partialorder %v1421_v22, 8.507059e+37 }
 0x324   : > { %1579 = vrot.lane.b32.xlu0 %v1440_v20, %s1967_s20  ;;  %v1398_v14 = vmul.f32 %v1937_v6, %v2992_v51  ;;  %v1481_v24 = vand.u32 2147483647, %v3008_v55  ;;  %v1803_v46 = vmul.f32 -1.442695, %v3015_v23  ;;  %1946 = vrcp.f32 %v3021_v49 }
 0x325   : > { %v1420_v48 = vsel %vm1419_vm12, %v1927_v57, %v1416_v37  ;;  %v1939_v31 = vpop.eup %1938  ;;  %vm1402_vm14 = vweird.f32 %v2992_v51  ;;  %vm3034_vm15 = vcmp.eq.f32.partialorder %v1406_v52, 8.507059e+37  ;;  %v1409_v27 = vor.u32 1.1754944e-38, %v1408_v19 }
 0x326   : > { %v1425_v58 = vsel %vm1422_vm13, %v1424_v56, %v1420_v48  ;;  %v1399_v40 = vsub.f32 1.0, %v1398_v14  ;;  %v1483_v30 = vand.u32 2147483648, %v3008_v55  ;;  %vm1403_vm1 = vweird.f32 %v1937_v6 }
 0x327   : > { %v1941_v33 = vpop.eup %1940  ;;  %1577 = vrot.lane.b32.xlu2 %v1425_v58, %s1967_s20  ;;  %1948 = vrcp.f32 %v3027_v29  ;;  %vm1477_vm2 = vweird.f32 %v3008_v55  ;;  %vm3042_vm3 = vcmp.eq.f32.partialorder %v1481_v24, 8.507059e+37  ;;  %v1466_v25 = vand.u32 2147483647, %v3019_v36  ;;  %vm1404_vm4 = vmor %vm1402_vm14, %vm1403_vm1 }
 0x328   : > { %v1400_v16 = vmul.f32 %v1937_v6, %v1399_v40  ;;  %v1473_v63 = vmul.f32 %v1941_v33, %v3008_v55  ;;  %v1943_v38 = vpop.eup %1942  ;;  %1950 = vpow2.f32 %v1803_v46  ;;  %v1468_v32 = vand.u32 2147483648, %v3019_v36 }
 0x329   : > { %v1945_v34 = vpop.eup %1944  ;;  %v3048_v28 = vadd.f32 1.0, %v1939_v31  ;;  %vm1478_vm5 = vweird.f32 %v1941_v33  ;;  %v1484_v59 = vor.u32 1.1754944e-38, %v1483_v30  ;;  %vm1462_vm6 = vweird.f32 %v3019_v36 }
 0x32a   : > { %v1401_v11 = vadd.f32 %v1937_v6, %v1400_v16  ;;  %v1474_v4 = vsub.f32 1.0, %v1473_v63  ;;  %v1458_v5 = vmul.f32 %v1945_v34, %v3019_v36  ;;  %v1947_v17 = vpop.eup %1946  ;;  %v3055_v22 = vadd.f32 1.0, %v1943_v38  ;;  %vm1479_vm10 = vmor %vm1477_vm2, %vm1478_vm5 }
 0x32b   : > { %1952 = vrcp.f32 %v3048_v28  ;;  %v1443_v51 = vmul.f32 %v1947_v17, %v3021_v49  ;;  %vm1447_vm7 = vweird.f32 %v3021_v49  ;;  %vm3062_vm8 = vcmp.eq.f32.partialorder %v1466_v25, 8.507059e+37 }
 0x32c   : > { %v1405_v15 = vsel %vm1404_vm4, %v1937_v6, %v1401_v11  ;;  %v1475_v20 = vmul.f32 %v1941_v33, %v1474_v4  ;;  %v1459_v60 = vsub.f32 1.0, %v1458_v5  ;;  %v1469_v6 = vor.u32 1.1754944e-38, %v1468_v32 }
 0x32d   : > { %v1410_v43 = vsel %vm3034_vm15, %v1409_v27, %v1405_v15  ;;  %v1949_v18 = vpop.eup %1948  ;;  %v1451_v52 = vand.u32 2147483647, %v3021_v49  ;;  %vm1463_vm0 = vweird.f32 %v1945_v34  ;;  %v1444_v14 = vsub.f32 1.0, %v1443_v51 }
 0x32e   : > { %1575 = vrot.lane.b32.xlu1 %v1410_v43, %s1967_s20  ;;  %v1476_v45 = vadd.f32 %v1941_v33, %v1475_v20  ;;  %v1951_v19 = vpop.eup %1950  ;;  %v1460_v56 = vmul.f32 %v1945_v34, %v1459_v60  ;;  %v1518_v48 = vmul.f32 %v1949_v18, %v3027_v29  ;;  %vm1448_vm11 = vweird.f32 %v1947_v17  ;;  %vm1464_vm12 = vmor %vm1462_vm6, %vm1463_vm0 }
 0x32f   : > { %v1453_v46 = vand.u32 2147483648, %v3021_v49  ;;  %1954 = vrcp.f32 %v3055_v22  ;;  %v1445_v40 = vmul.f32 %v1947_v17, %v1444_v14  ;;  %vm3078_vm13 = vcmp.eq.f32.partialorder %v1451_v52, 8.507059e+37  ;;  %vm1449_vm15 = vmor %vm1447_vm7, %vm1448_vm11 }
 0x330   : > { %v1480_v24 = vsel %vm1479_vm10, %v1941_v33, %v1476_v45  ;;  %v1461_v58 = vadd.f32 %v1945_v34, %v1460_v56  ;;  %v1519_v41 = vsub.f32 1.0, %v1518_v48  ;;  %vm1523_vm14 = vweird.f32 %v1949_v18 }
 0x331   : > { %v1485_v31 = vsel %vm3042_vm3, %v1484_v59, %v1480_v24  ;;  %v1953_v27 = vpop.eup %1952  ;;  %v1528_v33 = vand.u32 2147483648, %v3027_v29  ;;  %v1306_v30 = vadd.f32 1.0, %v1951_v19  ;;  %v1446_v63 = vadd.f32 %v1947_v17, %v1445_v40 }
 0x332   : > { %1585 = vrot.lane.b32.xlu0 %v1485_v31, %s1967_s20  ;;  %v1465_v16 = vsel %vm1464_vm12, %v1945_v34, %v1461_v58  ;;  %v1520_v38 = vmul.f32 %v1949_v18, %v1519_v41  ;;  %v1503_v57 = vmul.f32 %v1953_v27, %v3048_v28  ;;  %v1454_v36 = vor.u32 1.1754944e-38, %v1453_v46 }
 0x333   : > { %v1470_v25 = vsel %vm3062_vm8, %v1469_v6, %v1465_v16  ;;  %vm1522_vm1 = vweird.f32 %v3027_v29  ;;  %v1526_v11 = vand.u32 2147483647, %v3027_v29  ;;  %v1450_v4 = vsel %vm1449_vm15, %v1947_v17, %v1446_v63 }
 0x334   : > { %1583 = vrot.lane.b32.xlu2 %v1470_v25, %s1967_s20  ;;  %v1521_v34 = vadd.f32 %v1949_v18, %v1520_v38  ;;  %v1504_v32 = vsub.f32 1.0, %v1503_v57  ;;  %1956 = vrcp.f32 %v1306_v30  ;;  %v1455_v5 = vsel %vm3078_vm13, %v1454_v36, %v1450_v4  ;;  %vm1524_vm2 = vmor %vm1522_vm1, %vm1523_vm14 }
 0x335   : > { %v1955_v59 = vpop.eup %1954  ;;  %v1529_v15 = vor.u32 1.1754944e-38, %v1528_v33  ;;  %v1511_v49 = vand.u32 2147483647, %v3048_v28  ;;  %v1513_v20 = vand.u32 2147483648, %v3048_v28  ;;  %vm1508_vm3 = vweird.f32 %v1953_v27 }
 0x336   : > { %1581 = vrot.lane.b32.xlu1 %v1455_v5, %s1967_s20  ;;  %v1525_v29 = vsel %vm1524_vm2, %v1949_v18, %v1521_v34  ;;  %v1505_v43 = vmul.f32 %v1953_v27, %v1504_v32  ;;  %v1488_v17 = vmul.f32 %v1955_v59, %v3055_v22  ;;  %vm1527_vm4 = vcmp.eq.f32.partialorder %v1526_v11, 8.507059e+37 }
 0x337   : > { %v1530_v60 = vsel %vm1527_vm4, %v1529_v15, %v1525_v29  ;;  %vm1507_vm5 = vweird.f32 %v3048_v28  ;;  %vm1512_vm7 = vcmp.eq.f32.partialorder %v1511_v49, 8.507059e+37  ;;  %v1514_v37 = vor.u32 1.1754944e-38, %v1513_v20 }
 0x338   : > { %v1506_v51 = vadd.f32 %v1953_v27, %v1505_v43  ;;  %v1489_v45 = vsub.f32 1.0, %v1488_v17  ;;  %vm1509_vm6 = vmor %vm1507_vm5, %vm1508_vm3  ;;  %v1498_v6 = vand.u32 2147483648, %v3055_v22  ;;  %vm1493_vm8 = vweird.f32 %v1955_v59 }
 0x339   : > { %v1496_v56 = vand.u32 2147483647, %v3055_v22  ;;  %vm1492_vm10 = vweird.f32 %v3055_v22  ;;  %vm1537_vm13 = vweird.f32 %v1306_v30  ;;  %v1541_v55 = vand.u32 2147483647, %v1306_v30 }
 0x33a   : > { %1591 = vrot.lane.b32.xlu0 %v1530_v60, %s1967_s20  ;;  %v1957_v52 = vpop.eup %1956  ;;  %v1510_v19 = vsel %vm1509_vm6, %v1953_v27, %v1506_v51  ;;  %v1490_v18 = vmul.f32 %v1955_v59, %v1489_v45  ;;  %vm1494_vm0 = vmor %vm1492_vm10, %vm1493_vm8  ;;  %v1499_v28 = vor.u32 1.1754944e-38, %v1498_v6  ;;  %v1543_v27 = vand.u32 2147483648, %v1306_v30 }
 0x33b   : > { %v1515_v14 = vsel %vm1512_vm7, %v1514_v37, %v1510_v19  ;;  %v1533_v48 = vmul.f32 %v1957_v52, %v1306_v30  ;;  %vm1497_vm11 = vcmp.eq.f32.partialorder %v1496_v56, 8.507059e+37  ;;  %vm1538_vm12 = vweird.f32 %v1957_v52  ;;  %v3249_v19 = vld [vmem:[#allocation9_spill] sm:$0xff] }
 0x33c   : > { %1589 = vrot.lane.b32.xlu2 %v1515_v14, %s1967_s20  ;;  %v1491_v24 = vadd.f32 %v1955_v59, %v1490_v18  ;;  %vm1539_vm14 = vmor %vm1537_vm13, %vm1538_vm12  ;;  %v1544_v16 = vor.u32 1.1754944e-38, %v1543_v27  ;;  %vm1542_vm15 = vcmp.eq.f32.partialorder %v1541_v55, 8.507059e+37  ;;  %v3250_v56 = vld [vmem:[#allocation5_spill] sm:$0xff] }
 0x33d   : > { %v1534_v46 = vsub.f32 1.0, %v1533_v48 }
 0x33e   : > { %v1495_v31 = vsel %vm1494_vm0, %v1955_v59, %v1491_v24  ;;  %v3251_v24 = vld [vmem:[#allocation10_spill] sm:$0xff] }
 0x33f   : > { %v1500_v58 = vsel %vm1497_vm11, %v1499_v28, %v1495_v31  ;;  %v1535_v40 = vmul.f32 %v1957_v52, %v1534_v46  ;;  %v3252_v28 = vld [vmem:[#allocation3_spill] sm:$0xff] }
 0x340   : > { %1587 = vrot.lane.b32.xlu1 %v1500_v58, %s1967_s20  ;;  %v3253_v58 = vld [vmem:[#allocation8_spill] sm:$0xff] }
 0x341   : > { %v1536_v41 = vadd.f32 %v1957_v52, %v1535_v40 }
 0x343   : > { %v1540_v33 = vsel %vm1539_vm14, %v1957_v52, %v1536_v41  ;;  %v3254_v41 = vld [vmem:[#allocation2_spill] sm:$0xff] }
 0x344   : > { %v1545_v22 = vsel %vm1542_vm15, %v1544_v16, %v1540_v33 }
 0x348   : > { %1593 = vrot.lane.b32.xlu1 %v1545_v22, %s1967_s20  ;;  %v3255_v22 = vld [vmem:[#allocation6_spill] sm:$0xff] }
 0x36f   : > { %v1566_v63 = vpop.permute.xlu2 %1565 }
 0x370   : > { %v1612_v38 = vmul.f32 %v1566_v63, %v2776_v50 }
 0x372   : > { %v1628_v57 = vadd.f32 %v1612_v38, %v2554_v9 }
 0x374   : > { %v1644_v30 = vmul.f32 0.70710677, %v1628_v57 }
 0x376   : > { %1660 = vst.msk [vmem:[%s3114_s10 + $0x8] sm:$0xff] %vm969_vm9, %v1644_v30 }
 0x377   : > { %v1572_v25 = vpop.permute.xlu2 %1571 }
 0x378   : > { %v1615_v36 = vmul.f32 %v1572_v25, %v2790_v61  ;;  %v3256_v25 = vld [vmem:[#allocation4_spill] sm:$0xff] }
 0x37a   : > { %v1631_v50 = vadd.f32 %v1615_v36, %v2577_v62 }
 0x37c   : > { %v1647_v11 = vmul.f32 0.70710677, %v1631_v50 }
 0x37e   : > { %1663 = vst.msk [vmem:[%s3114_s10 + $0x20] sm:$0xff] %vm969_vm9, %v1647_v11 }
 0x381   : > { %v1578_v9 = vpop.permute.xlu2 %1577 }
 0x382   : > { %v1618_v4 = vmul.f32 %v1578_v9, %v2808_v54 }
 0x384   : > { %v1634_v34 = vadd.f32 %v1618_v4, %v2607_v2 }
 0x386   : > { %v1568_v32 = vpop.permute.xlu0 %1567  ;;  %v1650_v5 = vmul.f32 0.70710677, %v1634_v34 }
 0x387   : > { %v1613_v59 = vmul.f32 %v1568_v32, %v2773_v7 }
 0x388   : > { %1666 = vst.msk [vmem:[%s3114_s10 + $0x38] sm:$0xff] %vm969_vm9, %v1650_v5 }
 0x389   : > { %v1629_v15 = vadd.f32 %v1613_v59, %v2559_v8  ;;  %v1564_v61 = vpop.permute.xlu1 %1563 }
 0x38a   : > { %v1611_v49 = vmul.f32 %v1564_v61, %v2779_v10 }
 0x38b   : > { %v1645_v62 = vmul.f32 0.70710677, %v1629_v15 }
 0x38c   : > { %v1627_v54 = vadd.f32 %v1611_v49, %v2549_v1 }
 0x38d   : > { %1661 = vst.msk [vmem:[%s3114_s10 + $0x10] sm:$0xff] %vm969_vm9, %v1645_v62 }
 0x38e   : > { %v1574_v20 = vpop.permute.xlu0 %1573  ;;  %v1643_v29 = vmul.f32 0.70710677, %v1627_v54  ;;  %v1584_v7 = vpop.permute.xlu2 %1583 }
 0x38f   : > { %v1616_v2 = vmul.f32 %v1574_v20, %v2767_v47  ;;  %v1621_v43 = vmul.f32 %v1584_v7, %v2836_v35 }
 0x390   : > { %1659 = vst.msk [vmem:[%s3114_s10] sm:$0xff] %vm969_vm9, %v1643_v29 }
 0x391   : > { %v1632_v8 = vadd.f32 %v1616_v2, %v2587_v53  ;;  %v1570_v17 = vpop.permute.xlu1 %1569  ;;  %v1637_v1 = vadd.f32 %v1621_v43, %v2564_v12 }
 0x392   : > { %v1614_v10 = vmul.f32 %v1570_v17, %v2797_v3 }
 0x393   : > { %v1648_v60 = vmul.f32 0.70710677, %v1632_v8  ;;  %v1653_v51 = vmul.f32 0.70710677, %v1637_v1 }
 0x394   : > { %v1630_v47 = vadd.f32 %v1614_v10, %v2567_v13 }
 0x395   : > { %1664 = vst.msk [vmem:[%s3114_s10 + $0x28] sm:$0xff] %vm969_vm9, %v1648_v60 }
 0x396   : > { %v1580_v45 = vpop.permute.xlu0 %1579  ;;  %v1646_v37 = vmul.f32 0.70710677, %v1630_v47  ;;  %1669 = vst.msk [vmem:[%s3114_s10 + $0x50] sm:$0xff] %vm969_vm9, %v1653_v51  ;;  %v1590_v53 = vpop.permute.xlu2 %1589 }
 0x397   : > { %v1619_v6 = vmul.f32 %v1580_v45, %v2760_v0  ;;  %v1624_v12 = vmul.f32 %v1590_v53, %v2857_v21 }
 0x398   : > { %1662 = vst.msk [vmem:[%s3114_s10 + $0x18] sm:$0xff] %vm969_vm9, %v1646_v37 }
 0x399   : > { %v1635_v3 = vadd.f32 %v1619_v6, %v2617_v44  ;;  %v1640_v52 = vadd.f32 %v1624_v12, %v2594_v42 }
 0x39b   : > { %v1651_v35 = vmul.f32 0.70710677, %v1635_v3  ;;  %v1656_v13 = vmul.f32 0.70710677, %v1640_v52 }
 0x39d   : > { %1667 = vst.msk [vmem:[%s3114_s10 + $0x40] sm:$0xff] %vm969_vm9, %v1651_v35 }
 0x39e   : > { %1672 = vst.msk [vmem:[%s3114_s10 + $0x68] sm:$0xff] %vm969_vm9, %v1656_v13 }
 0x3a0   : > { %v1576_v0 = vpop.permute.xlu1 %1575 }
 0x3a1   : > { %v1617_v18 = vmul.f32 %v1576_v0, %v3249_v19 }
 0x3a3   : > { %v1633_v14 = vadd.f32 %v1617_v18, %v3250_v56 }
 0x3a4   : > { %v1586_v48 = vpop.permute.xlu0 %1585 }
 0x3a5   : > { %v1649_v44 = vmul.f32 0.70710677, %v1633_v14  ;;  %v1622_v21 = vmul.f32 %v1586_v48, %v3251_v24 }
 0x3a7   : > { %1665 = vst.msk [vmem:[%s3114_s10 + $0x30] sm:$0xff] %vm969_vm9, %v1649_v44  ;;  %v1638_v42 = vadd.f32 %v1622_v21, %v3252_v28 }
 0x3a8   : > { %v1582_v31 = vpop.permute.xlu1 %1581 }
 0x3a9   : > { %v1654_v46 = vmul.f32 0.70710677, %v1638_v42  ;;  %v1620_v40 = vmul.f32 %v1582_v31, %v3253_v58 }
 0x3ab   : > { %1670 = vst.msk [vmem:[%s3114_s10 + $0x58] sm:$0xff] %vm969_vm9, %v1654_v46  ;;  %v1636_v27 = vadd.f32 %v1620_v40, %v3254_v41 }
 0x3ac   : > { %v1592_v55 = vpop.permute.xlu0 %1591 }
 0x3ad   : > { %v1625_v33 = vmul.f32 %v1592_v55, %v2849_v26  ;;  %v1652_v16 = vmul.f32 0.70710677, %v1636_v27  ;;  %v3257_v26 = vld [vmem:[#allocation7_spill] sm:$0xff] }
 0x3af   : > { %v1641_v63 = vadd.f32 %v1625_v33, %v3255_v22  ;;  %1668 = vst.msk [vmem:[%s3114_s10 + $0x48] sm:$0xff] %vm969_vm9, %v1652_v16 }
 0x3b1   : > { %v1657_v38 = vmul.f32 0.70710677, %v1641_v63 }
 0x3b2   : > { %v1588_v57 = vpop.permute.xlu1 %1587 }
 0x3b3   : > { %1673 = vst.msk [vmem:[%s3114_s10 + $0x70] sm:$0xff] %vm969_vm9, %v1657_v38  ;;  %v1623_v30 = vmul.f32 %v1588_v57, %v2997_v39 }
 0x3b5   : > { %v1639_v36 = vadd.f32 %v1623_v30, %v3256_v25 }
 0x3b7   : > { %v1655_v50 = vmul.f32 0.70710677, %v1639_v36 }
 0x3b9   : > { %1671 = vst.msk [vmem:[%s3114_s10 + $0x60] sm:$0xff] %vm969_vm9, %v1655_v50 }
 0x3ba   : > { %v1594_v11 = vpop.permute.xlu1 %1593 }
 0x3bb   : > { %v1626_v9 = vmul.f32 %v1594_v11, %v3015_v23 }
 0x3bd   : > { %v1642_v4 = vadd.f32 %v1626_v9, %v3257_v26 }
 0x3bf   : > { %v1658_v34 = vmul.f32 0.70710677, %v1642_v4 }
 0x3c1   : > { %1674 = vst.msk [vmem:[%s3114_s10 + $0x78] sm:$0xff] %vm969_vm9, %v1658_v34 }
 0x3c2 PF: > { %s17_s24 = sadd.s32 1, %s1964_s24  }
 0x3c3   : > { %p14_p4 = scmp.ge.s32.totalorder %s17_s24, 4  }
 0x3c5   :  { %16 = sbr.rel (!%p14_p4) target bundleno = 1 (0x1), region = 78 }

</bundles_post_ra>
